<compile_context>
chip_gen: v5e
topology: v5e:2x2
jax: 0.10.0
libtpu: 0.0.40
codegen_flags: <defaults>
</compile_context>

<pallas_src>
import functools

import jax
import jax.numpy as jnp
from jax.experimental import pallas as pl
from jax.experimental.pallas import tpu as pltpu


def _kld_kernel(pred_ref, tgt_ref, out_ref, *, taf, fun, eps):
    # Blocks are (5, R, L): component-major, each component a dense (R, L) tile.
    p = pred_ref[...].astype(jnp.float32)
    t = tgt_ref[...].astype(jnp.float32)

    px, py, pw, ph, pa = p[0], p[1], p[2], p[3], p[4]
    tx, ty, tw, th, ta = t[0], t[1], t[2], t[3], t[4]

    dx = px - tx
    dy = py - ty
    da = pa - ta

    # Shared transcendentals (EUP).  sin(da) is derived from cos(da).
    cos_t = jnp.cos(ta)
    sin_t = jnp.sin(ta)
    cos_d = jnp.cos(da)

    tw2 = tw * tw
    th2 = th * th
    pw2 = pw * pw
    ph2 = ph * ph

    # Exact divides (not approx reciprocals) to keep parity with the reference.
    inv_tw2 = 1.0 / tw2
    inv_th2 = 1.0 / th2

    a = dx * cos_t + dy * sin_t
    b = dy * cos_t - dx * sin_t

    # 0.5 * (4*a^2/tw^2 + 4*b^2/th^2)
    term1 = 2.0 * (a * a) * inv_tw2 + 2.0 * (b * b) * inv_th2

    cos_d2 = cos_d * cos_d
    sin_d2 = 1.0 - cos_d2
    term2 = 0.5 * ((ph2 * inv_tw2 + pw2 * inv_th2) * sin_d2
                   + (ph2 * inv_th2 + pw2 * inv_tw2) * cos_d2)

    # 0.5*(log(th2/ph2) + log(tw2/pw2)) == 0.5*log((th2*tw2)/(ph2*pw2))
    term3 = 0.5 * jnp.log((th2 * tw2) / (ph2 * pw2))

    kld = term1 + term2 + term3 - 1.0

    if fun == "sqrt":
        kld = jnp.sqrt(jnp.maximum(kld, eps))
    elif fun == "log1p":
        kld = jnp.log1p(jnp.maximum(kld, eps))
    # else: pass-through, matching the PyTorch module.

    out_ref[...] = (1.0 - 1.0 / (taf + kld)).astype(out_ref.dtype)


def _round_up(x, m):
    return ((x + m - 1) // m) * m


def kld_loss(pred, target, *, taf=1.0, fun="sqrt", eps=1e-7,
             lanes=512, max_rows_per_block=128):
    """Pallas KLDloss. pred/target reshape to (-1, 5); returns per-box loss (N,)."""
    pred = pred.reshape(-1, 5)
    target = target.reshape(-1, 5)
    assert pred.shape == target.shape
    n = pred.shape[0]
    if n == 0:
        return jnp.zeros((0,), jnp.float32)

    # --- Layout: (N, 5) -> padded (n_pad, 5) -> (5, n_rows, L), lane/sublane dense.
    n_rows = pl.cdiv(n, lanes)
    n_rows = _round_up(n_rows, 8)          # sublane constraint (multiple of 8)
    n_pad = n_rows * lanes
    if n_pad != n:
        # Pad with 1.0 so padded widths/heights stay positive (kld = 0 there,
        # no NaN/Inf lanes); padded outputs are sliced off below.
        pred = jnp.pad(pred, ((0, n_pad - n), (0, 0)), constant_values=1.0)
        target = jnp.pad(target, ((0, n_pad - n), (0, 0)), constant_values=1.0)
    # Single materialized copy per input: reshape is free, transpose does the work.
    p_t = jnp.transpose(pred.reshape(n_rows, lanes, 5), (2, 0, 1))
    t_t = jnp.transpose(target.reshape(n_rows, lanes, 5), (2, 0, 1))

    # --- Block rows: largest multiple of 8 (<= max_rows_per_block) dividing n_rows.
    r_block = 8
    cap = min(max_rows_per_block, n_rows)
    for cand in range(cap - cap % 8, 7, -8):
        if n_rows % cand == 0:
            r_block = cand
            break

    kernel = functools.partial(_kld_kernel, taf=float(taf), fun=fun, eps=float(eps))

    out = pl.pallas_call(
        kernel,
        out_shape=jax.ShapeDtypeStruct((n_rows, lanes), jnp.float32),
        grid_spec=pltpu.PrefetchScalarGridSpec(
            num_scalar_prefetch=0,
            grid=(n_rows // r_block,),
            in_specs=[
                pl.BlockSpec((5, r_block, lanes), lambda i: (0, i, 0)),
                pl.BlockSpec((5, r_block, lanes), lambda i: (0, i, 0)),
            ],
            out_specs=pl.BlockSpec((r_block, lanes), lambda i: (i, 0)),
        ),
        compiler_params=pltpu.CompilerParams(
            # Pure elementwise, no reduction axis -> fully parallel (shards across
            # both v7x TensorCores; harmless on single-TC v5e/v6e).
            dimension_semantics=("parallel",)),
    )(p_t, t_t)

    return out.reshape(n_pad)[:n]


def kld_loss_ref(pred, target, taf=1.0, fun="sqrt"):
    """Pure-JAX reference mirroring the PyTorch KLDloss.forward."""
    pred = pred.reshape(-1, 5).astype(jnp.float32)
    target = target.reshape(-1, 5).astype(jnp.float32)
    dx = pred[:, 0] - target[:, 0]
    dy = pred[:, 1] - target[:, 1]
    ta = target[:, 4]
    da = pred[:, 4] - ta
    kld = (0.5 * (4 * (dx * jnp.cos(ta) + dy * jnp.sin(ta)) ** 2 / target[:, 2] ** 2
                  + 4 * (dy * jnp.cos(ta) - dx * jnp.sin(ta)) ** 2 / target[:, 3] ** 2)
           + 0.5 * (pred[:, 3] ** 2 / target[:, 2] ** 2 * jnp.sin(da) ** 2
                    + pred[:, 2] ** 2 / target[:, 3] ** 2 * jnp.sin(da) ** 2
                    + pred[:, 3] ** 2 / target[:, 3] ** 2 * jnp.cos(da) ** 2
                    + pred[:, 2] ** 2 / target[:, 2] ** 2 * jnp.cos(da) ** 2)
           + 0.5 * (jnp.log(target[:, 3] ** 2 / pred[:, 3] ** 2)
                    + jnp.log(target[:, 2] ** 2 / pred[:, 2] ** 2))
           - 1.0)
    if fun == "sqrt":
        kld = jnp.sqrt(jnp.maximum(kld, 1e-7))
    elif fun == "log1p":
        kld = jnp.log1p(jnp.maximum(kld, 1e-7))
    return 1.0 - 1.0 / (taf + kld)


if __name__ == "__main__":
    key = jax.random.PRNGKey(0)
    k1, k2, k3, k4, k5, k6 = jax.random.split(key, 6)

    # Small set of rotated boxes: rows are [x, y, w, h, angle]; N is deliberately
    # not a multiple of 128 to exercise the padded-tail path.
    n_boxes = 300
    pxy = jax.random.normal(k1, (n_boxes, 2), dtype=jnp.float32)
    pwh = jax.random.uniform(k2, (n_boxes, 2), minval=0.5, maxval=2.0, dtype=jnp.float32)
    pang = jax.random.uniform(k3, (n_boxes, 1), minval=-1.5, maxval=1.5, dtype=jnp.float32)
    pred = jnp.concatenate([pxy, pwh, pang], axis=1)

    txy = jax.random.normal(k4, (n_boxes, 2), dtype=jnp.float32)
    twh = jax.random.uniform(k5, (n_boxes, 2), minval=0.5, maxval=2.0, dtype=jnp.float32)
    tang = jax.random.uniform(k6, (n_boxes, 1), minval=-1.5, maxval=1.5, dtype=jnp.float32)
    target = jnp.concatenate([txy, twh, tang], axis=1)

    out = kld_loss(pred, target, taf=1.0, fun="sqrt")
    out = jax.block_until_ready(out)
    ref = kld_loss_ref(pred, target, taf=1.0, fun="sqrt")
    assert out.shape == ref.shape == (n_boxes,)
    assert jnp.allclose(out, ref, rtol=1e-4, atol=1e-5), float(jnp.max(jnp.abs(out - ref)))

    # Also exercise the 'log1p' branch of the module.
    out2 = jax.block_until_ready(kld_loss(pred, target, taf=1.0, fun="log1p"))
    ref2 = kld_loss_ref(pred, target, taf=1.0, fun="log1p")
    assert jnp.allclose(out2, ref2, rtol=1e-4, atol=1e-5)

    print("KERNEL_OK")
</pallas_src>

<mosaic_0001>
module attributes {stable_mosaic.version = 11 : i64} {
  func.func @_kld_kernel(%arg0: i32, %arg1: memref<5x8x512xf32, #tpu.memory_space<vmem>>, %arg2: memref<5x8x512xf32, #tpu.memory_space<vmem>>, %arg3: memref<8x512xf32, #tpu.memory_space<vmem>>) attributes {dimension_semantics = [#tpu.dimension_semantics<parallel>], iteration_bounds = array<i64: 1>, scalar_prefetch = 0 : i64, scratch_operands = 0 : i64, tpu.core_type = #tpu.core_type<tc>, window_params = [{transform_indices = @transform_0, window_bounds = array<i64: 5, 8, 512>}, {transform_indices = @transform_1, window_bounds = array<i64: 5, 8, 512>}, {transform_indices = @transform_2, window_bounds = array<i64: 8, 512>}]} {
    %c0 = arith.constant 0 : index
    %c0_0 = arith.constant 0 : index
    %c0_1 = arith.constant 0 : index
    %0 = vector.load %arg1[%c0, %c0_0, %c0_1] : memref<5x8x512xf32, #tpu.memory_space<vmem>>, vector<5x8x512xf32>
    %c0_2 = arith.constant 0 : index
    %c0_3 = arith.constant 0 : index
    %c0_4 = arith.constant 0 : index
    %1 = vector.load %arg2[%c0_2, %c0_3, %c0_4] : memref<5x8x512xf32, #tpu.memory_space<vmem>>, vector<5x8x512xf32>
    %2 = vector.extract_strided_slice %0 {offsets = [0, 0, 0], sizes = [1, 8, 512], strides = [1, 1, 1]} : vector<5x8x512xf32> to vector<1x8x512xf32>
    %3 = vector.shape_cast %2 : vector<1x8x512xf32> to vector<8x512xf32>
    %4 = vector.extract_strided_slice %0 {offsets = [1, 0, 0], sizes = [1, 8, 512], strides = [1, 1, 1]} : vector<5x8x512xf32> to vector<1x8x512xf32>
    %5 = vector.shape_cast %4 : vector<1x8x512xf32> to vector<8x512xf32>
    %6 = vector.extract_strided_slice %0 {offsets = [2, 0, 0], sizes = [1, 8, 512], strides = [1, 1, 1]} : vector<5x8x512xf32> to vector<1x8x512xf32>
    %7 = vector.shape_cast %6 : vector<1x8x512xf32> to vector<8x512xf32>
    %8 = vector.extract_strided_slice %0 {offsets = [3, 0, 0], sizes = [1, 8, 512], strides = [1, 1, 1]} : vector<5x8x512xf32> to vector<1x8x512xf32>
    %9 = vector.shape_cast %8 : vector<1x8x512xf32> to vector<8x512xf32>
    %10 = vector.extract_strided_slice %0 {offsets = [4, 0, 0], sizes = [1, 8, 512], strides = [1, 1, 1]} : vector<5x8x512xf32> to vector<1x8x512xf32>
    %11 = vector.shape_cast %10 : vector<1x8x512xf32> to vector<8x512xf32>
    %12 = vector.extract_strided_slice %1 {offsets = [0, 0, 0], sizes = [1, 8, 512], strides = [1, 1, 1]} : vector<5x8x512xf32> to vector<1x8x512xf32>
    %13 = vector.shape_cast %12 : vector<1x8x512xf32> to vector<8x512xf32>
    %14 = vector.extract_strided_slice %1 {offsets = [1, 0, 0], sizes = [1, 8, 512], strides = [1, 1, 1]} : vector<5x8x512xf32> to vector<1x8x512xf32>
    %15 = vector.shape_cast %14 : vector<1x8x512xf32> to vector<8x512xf32>
    %16 = vector.extract_strided_slice %1 {offsets = [2, 0, 0], sizes = [1, 8, 512], strides = [1, 1, 1]} : vector<5x8x512xf32> to vector<1x8x512xf32>
    %17 = vector.shape_cast %16 : vector<1x8x512xf32> to vector<8x512xf32>
    %18 = vector.extract_strided_slice %1 {offsets = [3, 0, 0], sizes = [1, 8, 512], strides = [1, 1, 1]} : vector<5x8x512xf32> to vector<1x8x512xf32>
    %19 = vector.shape_cast %18 : vector<1x8x512xf32> to vector<8x512xf32>
    %20 = vector.extract_strided_slice %1 {offsets = [4, 0, 0], sizes = [1, 8, 512], strides = [1, 1, 1]} : vector<5x8x512xf32> to vector<1x8x512xf32>
    %21 = vector.shape_cast %20 : vector<1x8x512xf32> to vector<8x512xf32>
    %22 = arith.subf %3, %13 : vector<8x512xf32>
    %23 = arith.subf %5, %15 : vector<8x512xf32>
    %24 = arith.subf %11, %21 : vector<8x512xf32>
    %25 = math.cos %21 : vector<8x512xf32>
    %26 = math.sin %21 : vector<8x512xf32>
    %27 = math.cos %24 : vector<8x512xf32>
    %28 = arith.mulf %17, %17 : vector<8x512xf32>
    %29 = arith.mulf %19, %19 : vector<8x512xf32>
    %30 = arith.mulf %7, %7 : vector<8x512xf32>
    %31 = arith.mulf %9, %9 : vector<8x512xf32>
    %cst = arith.constant 1.000000e+00 : f32
    %32 = vector.broadcast %cst : f32 to vector<8x512xf32>
    %33 = arith.divf %32, %28 : vector<8x512xf32>
    %cst_5 = arith.constant 1.000000e+00 : f32
    %34 = vector.broadcast %cst_5 : f32 to vector<8x512xf32>
    %35 = arith.divf %34, %29 : vector<8x512xf32>
    %36 = arith.mulf %22, %25 : vector<8x512xf32>
    %37 = arith.mulf %23, %26 : vector<8x512xf32>
    %38 = arith.addf %36, %37 : vector<8x512xf32>
    %39 = arith.mulf %23, %25 : vector<8x512xf32>
    %40 = arith.mulf %22, %26 : vector<8x512xf32>
    %41 = arith.subf %39, %40 : vector<8x512xf32>
    %42 = arith.mulf %38, %38 : vector<8x512xf32>
    %cst_6 = arith.constant 2.000000e+00 : f32
    %43 = vector.broadcast %cst_6 : f32 to vector<8x512xf32>
    %44 = arith.mulf %43, %42 : vector<8x512xf32>
    %45 = arith.mulf %44, %33 : vector<8x512xf32>
    %46 = arith.mulf %41, %41 : vector<8x512xf32>
    %cst_7 = arith.constant 2.000000e+00 : f32
    %47 = vector.broadcast %cst_7 : f32 to vector<8x512xf32>
    %48 = arith.mulf %47, %46 : vector<8x512xf32>
    %49 = arith.mulf %48, %35 : vector<8x512xf32>
    %50 = arith.addf %45, %49 : vector<8x512xf32>
    %51 = arith.mulf %27, %27 : vector<8x512xf32>
    %cst_8 = arith.constant 1.000000e+00 : f32
    %52 = vector.broadcast %cst_8 : f32 to vector<8x512xf32>
    %53 = arith.subf %52, %51 : vector<8x512xf32>
    %54 = arith.mulf %31, %33 : vector<8x512xf32>
    %55 = arith.mulf %30, %35 : vector<8x512xf32>
    %56 = arith.addf %54, %55 : vector<8x512xf32>
    %57 = arith.mulf %56, %53 : vector<8x512xf32>
    %58 = arith.mulf %31, %35 : vector<8x512xf32>
    %59 = arith.mulf %30, %33 : vector<8x512xf32>
    %60 = arith.addf %58, %59 : vector<8x512xf32>
    %61 = arith.mulf %60, %51 : vector<8x512xf32>
    %62 = arith.addf %57, %61 : vector<8x512xf32>
    %cst_9 = arith.constant 5.000000e-01 : f32
    %63 = vector.broadcast %cst_9 : f32 to vector<8x512xf32>
    %64 = arith.mulf %63, %62 : vector<8x512xf32>
    %65 = arith.mulf %29, %28 : vector<8x512xf32>
    %66 = arith.mulf %31, %30 : vector<8x512xf32>
    %67 = arith.divf %65, %66 : vector<8x512xf32>
    %68 = math.log %67 : vector<8x512xf32>
    %cst_10 = arith.constant 5.000000e-01 : f32
    %69 = vector.broadcast %cst_10 : f32 to vector<8x512xf32>
    %70 = arith.mulf %69, %68 : vector<8x512xf32>
    %71 = arith.addf %50, %64 : vector<8x512xf32>
    %72 = arith.addf %71, %70 : vector<8x512xf32>
    %cst_11 = arith.constant 1.000000e+00 : f32
    %73 = vector.broadcast %cst_11 : f32 to vector<8x512xf32>
    %74 = arith.subf %72, %73 : vector<8x512xf32>
    %cst_12 = arith.constant 1.000000e-07 : f32
    %75 = vector.broadcast %cst_12 : f32 to vector<8x512xf32>
    %76 = arith.maximumf %74, %75 : vector<8x512xf32>
    %77 = math.sqrt %76 : vector<8x512xf32>
    %cst_13 = arith.constant 1.000000e+00 : f32
    %78 = vector.broadcast %cst_13 : f32 to vector<8x512xf32>
    %79 = arith.addf %78, %77 : vector<8x512xf32>
    %cst_14 = arith.constant 1.000000e+00 : f32
    %80 = vector.broadcast %cst_14 : f32 to vector<8x512xf32>
    %81 = arith.divf %80, %79 : vector<8x512xf32>
    %cst_15 = arith.constant 1.000000e+00 : f32
    %82 = vector.broadcast %cst_15 : f32 to vector<8x512xf32>
    %83 = arith.subf %82, %81 : vector<8x512xf32>
    %c0_16 = arith.constant 0 : index
    %c0_17 = arith.constant 0 : index
    %84 = vector.load %arg3[%c0_16, %c0_17] : memref<8x512xf32, #tpu.memory_space<vmem>>, vector<8x512xf32>
    tpu.vector_store %arg3[%c0_16, %c0_17], %83 {strides = array<i32>} : memref<8x512xf32, #tpu.memory_space<vmem>>, vector<8x512xf32>,
    return
  }
  func.func @transform_0(%arg0: i32) -> (i32, i32, i32) {
    %c0_i32 = arith.constant 0 : i32
    %c0_i32_0 = arith.constant 0 : i32
    %c0_i32_1 = arith.constant 0 : i32
    return %c0_i32, %arg0, %c0_i32_0 : i32, i32, i32
  }
  func.func @transform_1(%arg0: i32) -> (i32, i32, i32) {
    %c0_i32 = arith.constant 0 : i32
    %c0_i32_0 = arith.constant 0 : i32
    %c0_i32_1 = arith.constant 0 : i32
    return %c0_i32, %arg0, %c0_i32_0 : i32, i32, i32
  }
  func.func @transform_2(%arg0: i32) -> (i32, i32) {
    %c0_i32 = arith.constant 0 : i32
    %c0_i32_0 = arith.constant 0 : i32
    return %arg0, %c0_i32 : i32, i32
  }
}

</mosaic_0001>

<bundles_post_ra>
// kernel: tpu_custom_call.1
= control target key start
LH: loop header
LB: loop body
LE: loop exit
PB: predicated region body
PF: predicated region fallthrough
CT: control target
= control target key end

     0   :  { %7 = vsyncpa [#allocation3], 0  ;;  %s4464_s0 = inlined_call_operand.hbm [shape: f32[5,8,512], index: 0, kind: input, shape index: {}]   ;;  %s4465_s1 = inlined_call_operand.hbm [shape: f32[5,8,512], index: 1, kind: input, shape index: {}]   ;;  %s4466_s2 = inlined_call_operand.hbm [shape: f32[8,512], index: 2, kind: output, shape index: {}]  }
   0x1   :  { %8 = vsyncpa [#allocation6], 0 }
   0x2   :  { %9 = vsyncpa [#allocation4], 0  ;;  %s14_s11 = sshll.u32 %s4464_s0, 4  ;;  %s2600_s12 = smov [#allocation2]   ;;  %s15_s11 = int_to_ptr.hbm [resolvable:$true] %s14_s11 }
   0x3   :  { %s16_s13 = sshll.u32 %s2600_s12, 4  ;;  %s27_s16 = sshll.u32 %s4465_s1, 4  ;;  %s17_s13 = int_to_ptr.vmem [resolvable:$true] %s16_s13  ;;  %s28_s16 = int_to_ptr.hbm [resolvable:$true] %s27_s16 }
   0x4   :  { %s2601_s17 = smov 512   ;;  %s2602_s18 = smov 32  }
   0x5   :  { %22 = dma.hbm_to_vmem [thread:$0]  %s15_s11, 2560, %s17_s13, [#allocation3], %s2601_s17, %s2601_s17, %s2602_s18  }
   0x6   :  { %s2603_s19 = smov [#allocation5]  }
   0x7   :  { %s29_s20 = sshll.u32 %s2603_s19, 4  ;;  %s30_s20 = int_to_ptr.vmem [resolvable:$true] %s29_s20 }
   0x8   :  { %35 = dma.hbm_to_vmem [thread:$0]  %s28_s16, 2560, %s30_s20, [#allocation6], %s2601_s17, %s2601_s17, %s2602_s18  }
   0x9   :  { %2594 = dma.done.wait [#allocation3], 2560  }
   0xa   :  { %2595 = vsyncadd [#allocation3], 4294964736 }
   0xb   :  { %2596 = dma.done.wait [#allocation6], 2560  }
   0xc   :  { %2597 = vsyncadd [#allocation6], 4294964736  ;;  %v2633_v0 = vld [vmem:[#allocation5 + $0x80] sm:$0xff]  ;;  %v2635_v1 = vld [vmem:[#allocation5 + $0x88] sm:$0xff]  ;;  %v4480_v27 = vmov 683565275  }
   0xd   :  { %v96_v2 = vand.u32 2147483647, %v2633_v0  ;;  %v2638_v3 = vld [vmem:[#allocation5 + $0x90] sm:$0xff]  ;;  %v99_v4 = vand.u32 2139095040, %v2633_v0  ;;  %v250_v6 = vand.u32 2147483647, %v2635_v1 }
   0xe   :  { %v253_v7 = vand.u32 2139095040, %v2635_v1  ;;  %v407_v10 = vand.u32 2139095040, %v2638_v3  ;;  %v4478_v29 = vmov 2475754826   ;;  %v4482_v31 = vmov 2131351028  }
   0xf   :  { %v103_v5 = vand.u32 8388607, %v96_v2  ;;  %v100_v8 = vshrl.u32 %v99_v4, 23  ;;  %v257_v14 = vand.u32 8388607, %v250_v6  ;;  %s2611_s0 = smov [#allocation7]  }
  0x10   :  { %v254_v9 = vshrl.u32 %v253_v7, 23  ;;  %v408_v17 = vshrl.u32 %v407_v10, 23  ;;  %v4485_v33 = vmov 2102212464   ;;  %v4471_v35 = vmov 920167782  }
  0x11   :  { %v2418_v11 = vadd.s32 4294967169, %v100_v8  ;;  %v104_v12 = vor.u32 8388608, %v103_v5  ;;  %v258_v20 = vor.u32 8388608, %v257_v14  ;;  %v4469_v44 = vmov 1326507024   ;;  %s2405_s1 = sshll.u32 %s2611_s0, 4  ;;  %s2406_s1 = int_to_ptr.vmem [resolvable:$true] %s2405_s1 }
  0x12   :  { %v2421_v13 = vadd.s32 4294967169, %v254_v9  ;;  %v2654_v25 = vadd.s32 4294967169, %v408_v17  ;;  %s2407_s23 = sshll.u32 %s4466_s2, 4  ;;  %s2408_s23 = int_to_ptr.hbm [resolvable:$true] %s2407_s23 }
  0x13   :  { %v106_v15 = vadd.s32 1, %v2418_v11  ;;  %v2648_v19 = vshll.u32 %v104_v12, 8  ;;  %v2662_v38 = vshll.u32 %v258_v20, 8 }
  0x14   :  { %v260_v16 = vadd.s32 1, %v2421_v13 }
  0x15   :  { %vm107_vm0 = vcmp.gt.s32.totalorder %v106_v15, 0  ;;  %v145_v37 = vand.u32 65535, %v2648_v19  ;;  %v146_v42 = vshrl.u32 %v2648_v19, 16 }
  0x16   :  { %v108_v18 = vsel %vm107_vm0, %v106_v15, 0  ;;  %vm261_vm1 = vcmp.gt.s32.totalorder %v260_v16, 0 }
  0x17   :  { %v110_v21 = vand.u32 31, %v108_v18  ;;  %v262_v22 = vsel %vm261_vm1, %v260_v16, 0  ;;  %v2650_v23 = vshrl.u32 %v108_v18, 5 }
  0x18   :  { %v2652_v24 = vand.u32 31, %v262_v22  ;;  %v2682_v55 = vshrl.u32 %v262_v22, 5 }
  0x19   :  { %v111_v26 = vsub.s32 32, %v110_v21  ;;  %v113_v28 = vshll.u32 %v4480_v27, %v110_v21  ;;  %v116_v30 = vshll.u32 %v4478_v29, %v110_v21  ;;  %v119_v32 = vshll.u32 %v4482_v31, %v110_v21 }
  0x1a   :  { %v122_v34 = vshll.u32 %v4485_v33, %v110_v21  ;;  %v125_v36 = vshll.u32 %v4471_v35, %v110_v21  ;;  %vm128_vm2 = vcmp.lt.s32.totalorder %v2650_v23, 1  ;;  %vm131_vm3 = vcmp.lt.s32.totalorder %v2650_v23, 4 }
  0x1b   :  { %v114_v39 = vshrl.u32 %v4478_v29, %v111_v26  ;;  %v117_v40 = vshrl.u32 %v4482_v31, %v111_v26  ;;  %v120_v41 = vshrl.u32 %v4485_v33, %v111_v26  ;;  %v123_v43 = vshrl.u32 %v4471_v35, %v111_v26 }
  0x1c   :  { %v126_v45 = vshrl.u32 %v4469_v44, %v111_v26  ;;  %v2673_v49 = vsub.s32 32, %v2652_v24  ;;  %v112_v50 = vshrl.u32 %v4480_v27, %v111_v26  ;;  %vm130_vm4 = vcmp.lt.s32.totalorder %v2650_v23, 3 }
  0x1d   :  { %v115_v46 = vor.u32 %v114_v39, %v113_v28  ;;  %v118_v47 = vor.u32 %v117_v40, %v116_v30  ;;  %v121_v48 = vor.u32 %v120_v41, %v119_v32  ;;  %v124_v51 = vor.u32 %v123_v43, %v122_v34 }
  0x1e   :  { %v127_v52 = vor.u32 %v126_v45, %v125_v36  ;;  %vm129_vm5 = vcmp.lt.s32.totalorder %v2650_v23, 2  ;;  %v267_v58 = vshll.u32 %v4480_v27, %v2652_v24  ;;  %v270_v59 = vshll.u32 %v4478_v29, %v2652_v24 }
  0x1f   :  { %v136_v53 = vsel %vm128_vm2, %v115_v46, %v118_v47  ;;  %v140_v54 = vsel %vm128_vm2, %v118_v47, %v121_v48  ;;  %v137_v56 = vsel %vm131_vm3, %v124_v51, 920167782  ;;  %v133_v60 = vsel %vm131_vm3, %v121_v48, 2102212464 }
  0x20   :  { %v141_v57 = vsel %vm131_vm3, %v127_v52, 1326507024  ;;  %v138_v61 = vsel %vm130_vm4, %v121_v48, %v137_v56  ;;  %v268_v63 = vshrl.u32 %v4478_v29, %v2673_v49  ;;  %v132_v4 = vsel %vm128_vm2, %v112_v50, %v115_v46 }
  0x21   :  { %v142_v62 = vsel %vm130_vm4, %v124_v51, %v141_v57  ;;  %v139_v5 = vsel %vm129_vm5, %v136_v53, %v138_v61  ;;  %v271_v8 = vshrl.u32 %v4482_v31, %v2673_v49  ;;  %v134_v13 = vsel %vm130_vm4, %v118_v47, %v133_v60 }
  0x22   :  { %v143_v7 = vsel %vm129_vm5, %v140_v54, %v142_v62  ;;  %v169_v11 = vand.u32 65535, %v139_v5  ;;  %v170_v12 = vshrl.u32 %v139_v5, 16  ;;  %v2710_v14 = vor.u32 %v268_v63, %v267_v58 }
  0x23   :  { %v147_v9 = vand.u32 65535, %v143_v7  ;;  %v148_v10 = vshrl.u32 %v143_v7, 16  ;;  %v2712_v15 = vor.u32 %v271_v8, %v270_v59  ;;  %v273_v16 = vshll.u32 %v4482_v31, %v2652_v24 }
  0x24   :  { %v274_v21 = vshrl.u32 %v4485_v33, %v2673_v49  ;;  %v171_v26 = vmul.u32 %v169_v11, %v145_v37  ;;  %v172_v28 = vmul.u32 %v170_v12, %v145_v37  ;;  %v173_v30 = vmul.u32 %v169_v11, %v146_v42 }
  0x25   :  { %v149_v17 = vmul.u32 %v147_v9, %v145_v37  ;;  %v150_v18 = vmul.u32 %v148_v10, %v145_v37  ;;  %v151_v20 = vmul.u32 %v147_v9, %v146_v42  ;;  %v152_v22 = vmul.u32 %v148_v10, %v146_v42 }
  0x26   :  { %v174_v39 = vmul.u32 %v170_v12, %v146_v42  ;;  %v175_v41 = vshll.u32 %v172_v28, 16  ;;  %v176_v43 = vshrl.u32 %v172_v28, 16  ;;  %v177_v45 = vshll.u32 %v173_v30, 16 }
  0x27   :  { %v153_v32 = vshll.u32 %v150_v18, 16  ;;  %v154_v34 = vshrl.u32 %v150_v18, 16  ;;  %v155_v36 = vshll.u32 %v151_v20, 16  ;;  %v156_v40 = vshrl.u32 %v151_v20, 16 }
  0x28   :  { %v178_v47 = vshrl.u32 %v173_v30, 16  ;;  %v276_v48 = vshll.u32 %v4485_v33, %v2652_v24  ;;  %v4473_v50 = vmov 0   ;;  %vm179_vm7 = vc.u32 %v171_v26, %v175_v41 }
  0x29   :  { %vm157_vm6 = vc.u32 %v149_v17, %v153_v32  ;;  %v159_v46 = vadd.s32 %v153_v32, %v149_v17  ;;  %v181_v37 = vadd.s32 %v175_v41, %v171_v26  ;;  %v277_v52 = vshrl.u32 %v4471_v35, %v2673_v49 }
  0x2a   :  { %v158_v51 = vsel %vm157_vm6, 1, %v4473_v50  ;;  %v180_v42 = vsel %vm179_vm7, 1, %v4473_v50  ;;  %v279_v54 = vshll.u32 %v4471_v35, %v2652_v24  ;;  %v2727_v58 = vor.u32 %v274_v21, %v273_v16 }
  0x2b   :  { %v160_v53 = vadd.s32 %v158_v51, %v152_v22  ;;  %vm161_vm8 = vc.u32 %v159_v46, %v155_v36  ;;  %v182_v57 = vadd.s32 %v180_v42, %v174_v39  ;;  %vm183_vm9 = vc.u32 %v181_v37, %v177_v45 }
  0x2c   :  { %v162_v56 = vsel %vm161_vm8, 1, %v4473_v50  ;;  %v184_v60 = vsel %vm183_vm9, 1, %v4473_v50  ;;  %v278_v61 = vor.u32 %v277_v52, %v276_v48  ;;  %v280_v62 = vshrl.u32 %v4469_v44, %v2673_v49 }
  0x2d   :  { %v164_v59 = vadd.s32 %v162_v56, %v160_v53  ;;  %v2732_v63 = vadd.s32 %v181_v37, %v177_v45  ;;  %v186_v5 = vadd.s32 %v184_v60, %v182_v57  ;;  %vm282_vm10 = vcmp.lt.s32.totalorder %v2682_v55, 1 }
  0x2e   :  { %vm284_vm11 = vcmp.lt.s32.totalorder %v2682_v55, 3  ;;  %v281_v7 = vor.u32 %v280_v62, %v279_v54  ;;  %vm283_vm12 = vcmp.lt.s32.totalorder %v2682_v55, 2  ;;  %vm285_vm13 = vcmp.lt.s32.totalorder %v2682_v55, 4 }
  0x2f   :  { %v165_v24 = vadd.s32 %v164_v59, %v154_v34  ;;  %v187_v8 = vadd.s32 %v186_v5, %v176_v43  ;;  %v290_v9 = vsel %vm282_vm10, %v2710_v14, %v2712_v15  ;;  %v291_v10 = vsel %vm285_vm13, %v278_v61, 920167782 }
  0x30   :  { %v299_v11 = vand.u32 65535, %v2662_v38  ;;  %v135_v12 = vsel %vm129_vm5, %v132_v4, %v134_v13  ;;  %v292_v17 = vsel %vm284_vm11, %v2727_v58, %v291_v10  ;;  %v294_v18 = vsel %vm282_vm10, %v2712_v15, %v2727_v58 }
  0x31   :  { %v2747_v16 = vadd.s32 %v165_v24, %v156_v40  ;;  %v188_v20 = vadd.s32 %v187_v8, %v178_v47  ;;  %v293_v21 = vsel %vm283_vm12, %v290_v9, %v292_v17  ;;  %v295_v22 = vsel %vm285_vm13, %v281_v7, 1326507024 }
  0x32   :  { %v300_v23 = vshrl.u32 %v2662_v38, 16  ;;  %v296_v4 = vsel %vm284_vm11, %v278_v61, %v295_v22  ;;  %v323_v13 = vand.u32 65535, %v293_v21  ;;  %v414_v26 = vadd.s32 1, %v2654_v25 }
  0x33   :  { %vm191_vm14 = vc.u32 %v2747_v16, %v2732_v63  ;;  %v189_v28 = vmul.u32 %v2648_v19, %v135_v12  ;;  %v192_v30 = vadd.s32 1, %v188_v20  ;;  %v297_v32 = vsel %vm283_vm12, %v294_v18, %v296_v4 }
  0x34   :  { %v324_v34 = vshrl.u32 %v293_v21, 16  ;;  %v301_v36 = vand.u32 65535, %v297_v32  ;;  %v302_v39 = vshrl.u32 %v297_v32, 16  ;;  %v327_v43 = vmul.u32 %v323_v13, %v300_v23 }
  0x35   :  { %v193_v40 = vsel %vm191_vm14, %v192_v30, %v188_v20  ;;  %v325_v47 = vmul.u32 %v323_v13, %v299_v11  ;;  %vm415_vm15 = vcmp.gt.s32.totalorder %v414_v26, 0  ;;  %v266_v8 = vshrl.u32 %v4480_v27, %v2673_v49 }
  0x36   :  { %v326_v41 = vmul.u32 %v324_v34, %v299_v11  ;;  %v303_v45 = vmul.u32 %v301_v36, %v299_v11  ;;  %v304_v46 = vmul.u32 %v302_v39, %v299_v11  ;;  %v194_v48 = vadd.s32 %v193_v40, %v189_v28 }
  0x37   :  { %v305_v51 = vmul.u32 %v301_v36, %v300_v23  ;;  %v306_v25 = vmul.u32 %v302_v39, %v300_v23  ;;  %v328_v53 = vmul.u32 %v324_v34, %v300_v23  ;;  %v331_v42 = vshll.u32 %v327_v43, 16 }
  0x38   :  { %v329_v37 = vshll.u32 %v326_v41, 16  ;;  %v307_v52 = vshll.u32 %v304_v46, 16  ;;  %v416_v54 = vsel %vm415_vm15, %v414_v26, 0  ;;  %v195_v57 = vadd.s32 536870912, %v194_v48 }
  0x39   :  { %v309_v19 = vshll.u32 %v305_v51, 16  ;;  %v418_v5 = vand.u32 31, %v416_v54  ;;  %v330_v9 = vshrl.u32 %v326_v41, 16  ;;  %v308_v12 = vshrl.u32 %v304_v46, 16 }
  0x3a   :  { %vm311_vm0 = vc.u32 %v303_v45, %v307_v52  ;;  %v313_v56 = vadd.s32 %v307_v52, %v303_v45  ;;  %vm333_vm1 = vc.u32 %v325_v47, %v329_v37  ;;  %v335_v61 = vadd.s32 %v329_v37, %v325_v47 }
  0x3b   :  { %v312_v59 = vsel %vm311_vm0, 1, %v4473_v50  ;;  %v334_v60 = vsel %vm333_vm1, 1, %v4473_v50  ;;  %v2775_v11 = vshrl.u32 %v195_v57, 30  ;;  %v287_v20 = vsel %vm285_vm13, %v2727_v58, 2102212464 }
  0x3c   :  { %v314_v62 = vadd.s32 %v312_v59, %v306_v25  ;;  %vm315_vm2 = vc.u32 %v313_v56, %v309_v19  ;;  %v336_v7 = vadd.s32 %v334_v60, %v328_v53  ;;  %vm337_vm3 = vc.u32 %v335_v61, %v331_v42 }
  0x3d   :  { %v316_v24 = vsel %vm315_vm2, 1, %v4473_v50  ;;  %v338_v10 = vsel %vm337_vm3, 1, %v4473_v50  ;;  %v2780_v21 = vsub.s32 32, %v418_v5  ;;  %v404_v22 = vand.u32 2147483647, %v2638_v3 }
  0x3e   :  { %v318_v17 = vadd.s32 %v316_v24, %v314_v62  ;;  %v340_v18 = vadd.s32 %v338_v10, %v336_v7  ;;  %v286_v49 = vsel %vm282_vm10, %v266_v8, %v2710_v14  ;;  %v332_v23 = vshrl.u32 %v327_v43, 16 }
  0x3f   :  { %v2786_v13 = vshrl.u32 %v416_v54, 5  ;;  %v197_v26 = vshll.u32 %v2775_v11, 30  ;;  %v288_v28 = vsel %vm284_vm11, %v2712_v15, %v287_v20  ;;  %v310_v30 = vshrl.u32 %v305_v51, 16 }
  0x40   :  { %v341_v4 = vadd.s32 %v340_v18, %v330_v9  ;;  %v319_v58 = vadd.s32 %v318_v17, %v308_v12  ;;  %v421_v32 = vshll.u32 %v4480_v27, %v418_v5  ;;  %v422_v34 = vshrl.u32 %v4478_v29, %v2780_v21 }
  0x41   :  { %v430_v36 = vshll.u32 %v4485_v33, %v418_v5  ;;  %v431_v14 = vshrl.u32 %v4471_v35, %v2780_v21  ;;  %v424_v39 = vshll.u32 %v4478_v29, %v418_v5  ;;  %v425_v40 = vshrl.u32 %v4482_v31, %v2780_v21 }
  0x42   :  { %v427_v41 = vshll.u32 %v4482_v31, %v418_v5  ;;  %v428_v15 = vshrl.u32 %v4485_v33, %v2780_v21  ;;  %v342_v43 = vadd.s32 %v341_v4, %v332_v23  ;;  %v411_v45 = vand.u32 8388607, %v404_v22 }
  0x43   :  { %v2806_v46 = vadd.s32 %v319_v58, %v310_v30  ;;  %v2808_v47 = vadd.s32 %v335_v61, %v331_v42  ;;  %v433_v51 = vshll.u32 %v4471_v35, %v418_v5  ;;  %v434_v37 = vshrl.u32 %v4469_v44, %v2780_v21 }
  0x44   :  { %v2813_v25 = vsub.s32 %v194_v48, %v197_v26  ;;  %v289_v52 = vsel %vm283_vm12, %v286_v49, %v288_v28  ;;  %v432_v19 = vor.u32 %v431_v14, %v430_v36  ;;  %v2817_v53 = vor.u32 %v422_v34, %v421_v32 }
  0x45   :  { %v2819_v54 = vor.u32 %v425_v40, %v424_v39  ;;  %v429_v56 = vor.u32 %v428_v15, %v427_v41  ;;  %vm439_vm4 = vcmp.lt.s32.totalorder %v2786_v13, 4  ;;  %v346_v42 = vadd.s32 1, %v342_v43 }
  0x46   :  { %vm436_vm5 = vcmp.lt.s32.totalorder %v2786_v13, 1  ;;  %vm438_vm6 = vcmp.lt.s32.totalorder %v2786_v13, 3  ;;  %vm345_vm7 = vc.u32 %v2806_v46, %v2808_v47  ;;  %v412_v48 = vor.u32 8388608, %v411_v45 }
  0x47   :  { %v435_v57 = vor.u32 %v434_v37, %v433_v51  ;;  %v343_v55 = vmul.u32 %v2662_v38, %v289_v52  ;;  %v445_v59 = vsel %vm439_vm4, %v432_v19, 920167782  ;;  %v200_v60 = vsub.s32 0, %v2813_v25 }
  0x48   :  { %vm437_vm8 = vcmp.lt.s32.totalorder %v2786_v13, 2  ;;  %v444_v61 = vsel %vm436_vm5, %v2817_v53, %v2819_v54  ;;  %v446_v62 = vsel %vm438_vm6, %v429_v56, %v445_v59  ;;  %vm199_vm9 = vcmp.lt.s32.totalorder %v2813_v25, 0 }
  0x49   :  { %v347_v5 = vsel %vm345_vm7, %v346_v42, %v342_v43  ;;  %v448_v38 = vsel %vm436_vm5, %v2819_v54, %v429_v56  ;;  %v449_v24 = vsel %vm439_vm4, %v435_v57, 1326507024  ;;  %v2843_v7 = vshll.u32 %v412_v48, 8 }
  0x4a   :  { %v447_v8 = vsel %vm437_vm8, %v444_v61, %v446_v62  ;;  %v450_v9 = vsel %vm438_vm6, %v432_v19, %v449_v24  ;;  %v201_v10 = vsel %vm199_vm9, %v200_v60, %v2813_v25  ;;  %v348_v12 = vadd.s32 %v347_v5, %v343_v55 }
  0x4b   :  { %v451_v17 = vsel %vm437_vm8, %v448_v38, %v450_v9  ;;  %v453_v18 = vand.u32 65535, %v2843_v7  ;;  %v454_v20 = vshrl.u32 %v2843_v7, 16  ;;  %v478_v4 = vshrl.u32 %v447_v8, 16 }
  0x4c   :  { %v455_v49 = vand.u32 65535, %v451_v17  ;;  %v456_v23 = vshrl.u32 %v451_v17, 16  ;;  %v202_v26 = vclz %v201_v10  ;;  %v349_v28 = vadd.s32 536870912, %v348_v12  ;;  %v2864_v10 = vld [vmem:[#allocation5 + $0x98] sm:$0xff] }
  0x4d   :  { %v477_v32 = vand.u32 65535, %v447_v8  ;;  %v480_v36 = vmul.u32 %v478_v4, %v453_v18  ;;  %v482_v48 = vmul.u32 %v478_v4, %v454_v20  ;;  %v420_v59 = vshrl.u32 %v4480_v27, %v2780_v21 }
  0x4e   :  { %v457_v30 = vmul.u32 %v455_v49, %v453_v18  ;;  %v458_v58 = vmul.u32 %v456_v23, %v453_v18  ;;  %v459_v34 = vmul.u32 %v455_v49, %v454_v20  ;;  %v2419_v39 = vadd.s32 4294967294, %v202_v26 }
  0x4f   :  { %v460_v40 = vmul.u32 %v456_v23, %v454_v20  ;;  %v2854_v41 = vshrl.u32 %v349_v28, 30  ;;  %v479_v15 = vmul.u32 %v477_v32, %v453_v18  ;;  %v481_v43 = vmul.u32 %v477_v32, %v454_v20 }
  0x50   :  { %v461_v14 = vshll.u32 %v458_v58, 16  ;;  %v463_v45 = vshll.u32 %v459_v34, 16  ;;  %v483_v52 = vshll.u32 %v480_v36, 16  ;;  %vm2420_vm11 = vcmp.lt.s32.totalorder %v2419_v39, 0 }
  0x51   :  { %v351_v42 = vshll.u32 %v2854_v41, 30  ;;  %v462_v57 = vshrl.u32 %v458_v58, 16  ;;  %v485_v55 = vshll.u32 %v481_v43, 16  ;;  %v441_v61 = vsel %vm439_vm4, %v429_v56, 2102212464 }
  0x52   :  { %vm465_vm10 = vc.u32 %v457_v30, %v461_v14  ;;  %v467_v37 = vadd.s32 %v461_v14, %v457_v30  ;;  %vm487_vm13 = vc.u32 %v479_v15, %v483_v52  ;;  %v489_v38 = vadd.s32 %v483_v52, %v479_v15 }
  0x53   :  { %v466_v51 = vsel %vm465_vm10, 1, %v4473_v50  ;;  %v488_v5 = vsel %vm487_vm13, 1, %v4473_v50  ;;  %v205_v24 = vsel %vm2420_vm11, 0, %v2419_v39  ;;  %v464_v8 = vshrl.u32 %v459_v34, 16 }
  0x54   :  { %v468_v19 = vadd.s32 %v466_v51, %v460_v40  ;;  %vm469_vm12 = vc.u32 %v467_v37, %v463_v45  ;;  %v490_v9 = vadd.s32 %v488_v5, %v482_v48  ;;  %v2866_v17 = vsub.s32 %v348_v12, %v351_v42 }
  0x55   :  { %v470_v60 = vsel %vm469_vm12, 1, %v4473_v50  ;;  %v484_v20 = vshrl.u32 %v480_v36, 16  ;;  %vm491_vm14 = vc.u32 %v489_v38, %v485_v55  ;;  %v440_v21 = vsel %vm436_vm5, %v420_v59, %v2817_v53 }
  0x56   :  { %v472_v62 = vadd.s32 %v470_v60, %v468_v19  ;;  %v442_v56 = vsel %vm438_vm6, %v2819_v54, %v441_v61  ;;  %v492_v49 = vsel %vm491_vm14, 1, %v4473_v50  ;;  %v210_v23 = vsub.s32 4294967266, %v205_v24 }
  0x57   :  { %v486_v4 = vshrl.u32 %v481_v43, 16  ;;  %v494_v26 = vadd.s32 %v492_v49, %v490_v9  ;;  %v2877_v12 = vadd.s32 %v489_v38, %v485_v55  ;;  %v561_v30 = vand.u32 2139095040, %v2864_v10  ;;  %v60_v43 = vld [vmem:[#allocation2 + $0x80] sm:$0xff] }
  0x58   :  { %v473_v18 = vadd.s32 %v472_v62, %v462_v57  ;;  %v354_v58 = vsub.s32 0, %v2866_v17  ;;  %v443_v53 = vsel %vm437_vm8, %v440_v21, %v442_v56  ;;  %vm353_vm15 = vcmp.lt.s32.totalorder %v2866_v17, 0 }
  0x59   :  { %v495_v32 = vadd.s32 %v494_v26, %v484_v20  ;;  %v562_v54 = vshrl.u32 %v561_v30, 23  ;;  %v190_v34 = vadd.s32 %v2732_v63, %v2747_v16  ;;  %v206_v36 = vsub.s32 32, %v205_v24 }
  0x5a   :  { %v2875_v28 = vadd.s32 %v473_v18, %v464_v8  ;;  %v211_v14 = vadd.s32 127, %v210_v23  ;;  %v497_v40 = vmul.u32 %v2843_v7, %v443_v53  ;;  %v355_v13 = vsel %vm353_vm15, %v354_v58, %v2866_v17 }
  0x5b   :  { %v496_v39 = vadd.s32 %v495_v32, %v486_v4  ;;  %v2427_v15 = vadd.s32 4294967169, %v562_v54  ;;  %v207_v37 = vshll.u32 %v2813_v25, %v205_v24  ;;  %v208_v52 = vshrl.u32 %v190_v34, %v206_v36 }
  0x5c   :  { %vm499_vm0 = vc.u32 %v2875_v28, %v2877_v12  ;;  %v212_v19 = vshll.u32 %v211_v14, 23  ;;  %v2892_v63 = vsub.f32 %v60_v43, %v2633_v0  ;;  %v356_v16 = vclz %v355_v13 }
  0x5d   :  { %v500_v45 = vadd.s32 1, %v496_v39  ;;  %v568_v51 = vadd.s32 1, %v2427_v15  ;;  %v209_v59 = vor.u32 %v208_v52, %v207_v37  ;;  %v4468_v5 = vand.u32 2147483647, %v2864_v10 }
  0x5e   :  { %v213_v60 = vor.u32 4788187, %v212_v19  ;;  %v2422_v61 = vadd.s32 4294967294, %v356_v16  ;;  %v1335_v25 = vand.u32 2139095040, %v2892_v63  ;;  %vm98_vm6 = vcmp.lt.s32.totalorder %v2633_v0, 0 }
  0x5f   :  { %v501_v42 = vsel %vm499_vm0, %v500_v45, %v496_v39  ;;  %vm569_vm1 = vcmp.gt.s32.totalorder %v568_v51, 0  ;;  %v216_v8 = vcvt.s32.f32 %v209_v59  ;;  %v565_v18 = vand.u32 8388607, %v4468_v5  ;;  %v70_v5 = vld [vmem:[#allocation5 + $0x30] sm:$0xff] }
  0x60   :  { %v502_v48 = vadd.s32 %v501_v42, %v497_v40  ;;  %v570_v7 = vsel %vm569_vm1, %v568_v51, 0  ;;  %v214_v9 = vand.u32 2147483647, %v213_v60  ;;  %vm2423_vm2 = vcmp.lt.s32.totalorder %v2422_v61, 0 }
  0x61   :  { %v572_v55 = vand.u32 31, %v570_v7  ;;  %v1336_v20 = vshrl.u32 %v1335_v25, 23  ;;  %v2905_v56 = vshrl.u32 %v570_v7, 5  ;;  %v2923_v14 = vsel %vm2423_vm2, 0, %v2422_v61 }
  0x62   :  { %v503_v57 = vadd.s32 536870912, %v502_v48  ;;  %v217_v36 = vmul.f32 %v216_v8, %v214_v9  ;;  %v566_v40 = vor.u32 8388608, %v565_v18  ;;  %v364_v16 = vsub.s32 4294967266, %v2923_v14 }
  0x63   :  { %v2899_v24 = vsub.s32 32, %v572_v55  ;;  %v575_v49 = vshll.u32 %v4480_v27, %v572_v55  ;;  %v578_v23 = vshll.u32 %v4478_v29, %v572_v55  ;;  %v581_v26 = vshll.u32 %v4482_v31, %v572_v55 }
  0x64   :  { %v2894_v62 = vshrl.u32 %v503_v57, 30  ;;  %v584_v30 = vshll.u32 %v4485_v33, %v572_v55  ;;  %v587_v54 = vshll.u32 %v4471_v35, %v572_v55  ;;  %v2442_v13 = vadd.s32 4294967169, %v1336_v20 }
  0x65   :  { %v576_v4 = vshrl.u32 %v4478_v29, %v2899_v24  ;;  %v585_v58 = vshrl.u32 %v4471_v35, %v2899_v24  ;;  %v579_v53 = vshrl.u32 %v4482_v31, %v2899_v24  ;;  %v582_v32 = vshrl.u32 %v4485_v33, %v2899_v24 }
  0x66   :  { %v505_v38 = vshll.u32 %v2894_v62, 30  ;;  %v588_v34 = vshrl.u32 %v4469_v44, %v2899_v24  ;;  %vm593_vm4 = vcmp.lt.s32.totalorder %v2905_v56, 4  ;;  %vm590_vm5 = vcmp.lt.s32.totalorder %v2905_v56, 1 }
  0x67   :  { %v586_v15 = vor.u32 %v585_v58, %v584_v30  ;;  %v2927_v45 = vor.u32 %v576_v4, %v575_v49  ;;  %v2929_v51 = vor.u32 %v579_v53, %v578_v23  ;;  %v2931_v37 = vor.u32 %v582_v32, %v581_v26 }
  0x68   :  { %v2903_v21 = vsub.s32 %v502_v48, %v505_v38  ;;  %v589_v43 = vor.u32 %v588_v34, %v587_v54  ;;  %v218_v52 = vxor.u32 2147483648, %v217_v36  ;;  %v2937_v42 = vshll.u32 %v566_v40, 8 }
  0x69   :  { %vm592_vm7 = vcmp.lt.s32.totalorder %v2905_v56, 3  ;;  %v599_v48 = vsel %vm593_vm4, %v586_v15, 920167782  ;;  %vm591_vm8 = vcmp.lt.s32.totalorder %v2905_v56, 2  ;;  %v598_v57 = vsel %vm590_vm5, %v2927_v45, %v2929_v51 }
  0x6a   :  { %v508_v39 = vsub.s32 0, %v2903_v21  ;;  %vm507_vm3 = vcmp.lt.s32.totalorder %v2903_v21, 0  ;;  %v603_v7 = vsel %vm593_vm4, %v589_v43, 1326507024  ;;  %v602_v55 = vsel %vm590_vm5, %v2929_v51, %v2931_v37 }
  0x6b   :  { %v1342_v59 = vadd.s32 1, %v2442_v13  ;;  %vm2956_vm9 = vcmp.le.f32.partialorder %v96_v2, 0.7853982  ;;  %v344_v61 = vadd.s32 %v2808_v47, %v2806_v46  ;;  %v219_v38 = vsel %vm98_vm6, %v218_v52, %v217_v36 }
  0x6c   :  { %v509_v19 = vsel %vm507_vm3, %v508_v39, %v2903_v21  ;;  %v600_v8 = vsel %vm592_vm7, %v2931_v37, %v599_v48  ;;  %v604_v9 = vsel %vm592_vm7, %v586_v15, %v603_v7  ;;  %v607_v18 = vand.u32 65535, %v2937_v42 }
  0x6d   :  { %v510_v25 = vclz %v509_v19  ;;  %v360_v2 = vsub.s32 32, %v2923_v14  ;;  %v601_v20 = vsel %vm591_vm8, %v598_v57, %v600_v8  ;;  %v605_v46 = vsel %vm591_vm8, %v602_v55, %v604_v9 }
  0x6e   :  { %v608_v47 = vshrl.u32 %v2937_v42, 16  ;;  %v365_v49 = vadd.s32 127, %v364_v16  ;;  %v609_v23 = vand.u32 65535, %v605_v46  ;;  %v610_v4 = vshrl.u32 %v605_v46, 16 }
  0x6f   :  { %vm1343_vm10 = vcmp.gt.s32.totalorder %v1342_v59, 0  ;;  %v2425_v26 = vadd.s32 4294967294, %v510_v25  ;;  %v631_v30 = vand.u32 65535, %v601_v20  ;;  %v632_v58 = vshrl.u32 %v601_v20, 16 }
  0x70   :  { %v2979_v53 = vsel %vm2956_vm9, %v2633_v0, %v219_v38  ;;  %v361_v32 = vshll.u32 %v2866_v17, %v2923_v14  ;;  %v611_v54 = vmul.u32 %v609_v23, %v607_v18  ;;  %v612_v34 = vmul.u32 %v610_v4, %v607_v18 }
  0x71   :  { %v2983_v36 = vmul.u32 %v609_v23, %v608_v47  ;;  %v633_v39 = vmul.u32 %v631_v30, %v607_v18  ;;  %v634_v40 = vmul.u32 %v632_v58, %v607_v18  ;;  %v1344_v15 = vsel %vm1343_vm10, %v1342_v59, 0 }
  0x72   :  { %v362_v43 = vshrl.u32 %v344_v61, %v360_v2  ;;  %v366_v13 = vshll.u32 %v365_v49, 23  ;;  %v615_v52 = vshll.u32 %v612_v34, 16  ;;  %v2985_v19 = vmul.u32 %v631_v30, %v608_v47 }
  0x73   :  { %vm2426_vm11 = vcmp.lt.s32.totalorder %v2425_v26, 0  ;;  %v617_v16 = vshll.u32 %v2983_v36, 16  ;;  %v636_v48 = vmul.u32 %v632_v58, %v608_v47  ;;  %v637_v7 = vshll.u32 %v634_v40, 16 }
  0x74   :  { %v614_v57 = vmul.u32 %v610_v4, %v608_v47  ;;  %vm619_vm12 = vc.u32 %v611_v54, %v615_v52  ;;  %v621_v17 = vadd.s32 %v615_v52, %v611_v54  ;;  %v1346_v14 = vand.u32 31, %v1344_v15 }
  0x75   :  { %v620_v55 = vsel %vm619_vm12, 1, %v4473_v50  ;;  %v639_v25 = vshll.u32 %v2985_v19, 16  ;;  %vm641_vm13 = vc.u32 %v633_v39, %v637_v7  ;;  %v4467_v59 = vand.u32 2147483647, %v2892_v63 }
  0x76   :  { %v2993_v61 = vmul.f32 %v2979_v53, %v2979_v53  ;;  %v2995_v38 = vor.u32 %v362_v43, %v361_v32  ;;  %vm623_vm14 = vc.u32 %v621_v17, %v617_v16  ;;  %v642_v8 = vsel %vm641_vm13, 1, %v4473_v50 }
  0x77   :  { %v367_v9 = vor.u32 4788187, %v366_v13  ;;  %v2999_v18 = vsel %vm2426_vm11, 0, %v2425_v26  ;;  %v643_v2 = vadd.s32 %v637_v7, %v633_v39  ;;  %v644_v20 = vadd.s32 %v642_v8, %v636_v48 }
  0x78   :  { %v622_v46 = vadd.s32 %v620_v55, %v614_v57  ;;  %v3001_v47 = vsub.s32 32, %v1346_v14  ;;  %v624_v49 = vsel %vm623_vm14, 1, %v4473_v50  ;;  %v1339_v23 = vand.u32 8388607, %v4467_v59  ;;  %v61_v59 = vld [vmem:[#allocation2 + $0x88] sm:$0xff] }
  0x79   :  { %vm645_vm15 = vc.u32 %v643_v2, %v639_v25  ;;  %v232_v4 = vmul.f32 -0.00019511016, %v2993_v61  ;;  %v370_v30 = vcvt.s32.f32 %v2995_v38  ;;  %v518_v58 = vsub.s32 4294967266, %v2999_v18 }
  0x7a   :  { %v646_v26 = vsel %vm645_vm15, 1, %v4473_v50  ;;  %v368_v32 = vand.u32 2147483647, %v367_v9  ;;  %v574_v54 = vshrl.u32 %v4480_v27, %v2899_v24  ;;  %v638_v39 = vshrl.u32 %v634_v40, 16 }
  0x7b   :  { %v648_v43 = vadd.s32 %v646_v26, %v644_v20  ;;  %v616_v13 = vshrl.u32 %v612_v34, 16  ;;  %v626_v52 = vadd.s32 %v624_v49, %v622_v46  ;;  %v1352_v16 = vshll.u32 %v4478_v29, %v1346_v14 }
  0x7c   :  { %v1353_v48 = vshrl.u32 %v4482_v31, %v3001_v47  ;;  %v498_v7 = vadd.s32 %v2877_v12, %v2875_v28  ;;  %v1340_v57 = vor.u32 8388608, %v1339_v23  ;;  %v1355_v17 = vshll.u32 %v4482_v31, %v1346_v14 }
  0x7d   :  { %v1356_v55 = vshrl.u32 %v4485_v33, %v3001_v47  ;;  %v514_v24 = vsub.s32 32, %v2999_v18  ;;  %v519_v40 = vadd.s32 127, %v518_v58  ;;  %v595_v34 = vsel %vm593_vm4, %v2931_v37, 2102212464 }
  0x7e   :  { %v3024_v38 = vshrl.u32 %v1344_v15, 5  ;;  %v640_v8 = vshrl.u32 %v2985_v19, 16  ;;  %v649_v9 = vadd.s32 %v648_v43, %v638_v39  ;;  %v1361_v28 = vshll.u32 %v4471_v35, %v1346_v14 }
  0x7f   :  { %v1362_v12 = vshrl.u32 %v4469_v44, %v3001_v47  ;;  %v594_v20 = vsel %vm590_vm5, %v574_v54, %v2927_v45  ;;  %v618_v46 = vshrl.u32 %v2983_v36, 16  ;;  %v627_v49 = vadd.s32 %v626_v52, %v616_v13 }
  0x80   :  { %v3034_v23 = vor.u32 %v1353_v48, %v1352_v16  ;;  %v3036_v37 = vor.u32 %v1356_v55, %v1355_v17  ;;  %v1358_v15 = vshll.u32 %v4485_v33, %v1346_v14  ;;  %v1359_v19 = vshrl.u32 %v4471_v35, %v3001_v47 }
  0x81   :  { %v1363_v58 = vor.u32 %v1362_v12, %v1361_v28  ;;  %v515_v26 = vshll.u32 %v2903_v21, %v2999_v18  ;;  %v596_v45 = vsel %vm592_vm7, %v2929_v51, %v595_v34  ;;  %vm1364_vm0 = vcmp.lt.s32.totalorder %v3024_v38, 1 }
  0x82   :  { %vm1367_vm1 = vcmp.lt.s32.totalorder %v3024_v38, 4  ;;  %v516_v36 = vshrl.u32 %v498_v7, %v514_v24  ;;  %v520_v54 = vshll.u32 %v519_v40, 23  ;;  %v650_v39 = vadd.s32 %v649_v9, %v640_v8 }
  0x83   :  { %v1349_v43 = vshll.u32 %v4480_v27, %v1346_v14  ;;  %v3049_v13 = vadd.s32 %v627_v49, %v618_v46  ;;  %v3051_v52 = vadd.s32 %v643_v2, %v639_v25  ;;  %v1350_v21 = vshrl.u32 %v4478_v29, %v3001_v47 }
  0x84   :  { %vm1366_vm2 = vcmp.lt.s32.totalorder %v3024_v38, 3  ;;  %v1360_v18 = vor.u32 %v1359_v19, %v1358_v15  ;;  %vm1365_vm3 = vcmp.lt.s32.totalorder %v3024_v38, 2  ;;  %v1376_v51 = vsel %vm1364_vm0, %v3034_v23, %v3036_v37 }
  0x85   :  { %v1377_v14 = vsel %vm1367_vm1, %v1363_v58, 1326507024  ;;  %v225_v16 = vmul.f32 -0.001358992, %v2993_v61  ;;  %v233_v25 = vadd.f32 0.008332121, %v232_v4  ;;  %v371_v2 = vmul.f32 %v370_v30, %v368_v32 }
  0x86   :  { %v597_v48 = vsel %vm591_vm8, %v594_v20, %v596_v45  ;;  %v654_v7 = vadd.s32 1, %v650_v39  ;;  %v1378_v17 = vsel %vm1366_vm2, %v1360_v18, %v1377_v14  ;;  %v3068_v55 = vshll.u32 %v1340_v57, 8  ;;  %v44_v45 = vld [vmem:[#allocation2] sm:$0xff]  ;;  %v71_v58 = vld [vmem:[#allocation5 + $0x38] sm:$0xff] }
  0x87   :  { %v517_v24 = vor.u32 %v516_v36, %v515_v26  ;;  %v521_v40 = vor.u32 4788187, %v520_v54  ;;  %vm653_vm4 = vc.u32 %v3049_v13, %v3051_v52  ;;  %v1379_v34 = vsel %vm1365_vm3, %v1376_v51, %v1378_v17  ;;  %v64_v36 = vld [vmem:[#allocation5] sm:$0xff]  ;;  %v46_v17 = vld [vmem:[#allocation2 + $0x10] sm:$0xff] }
  0x88   :  { %vm252_vm5 = vcmp.lt.s32.totalorder %v2635_v1, 0  ;;  %v3075_v4 = vor.u32 %v1350_v21, %v1349_v43  ;;  %v3078_v56 = vand.u32 65535, %v3068_v55  ;;  %v1384_v30 = vshrl.u32 %v1379_v34, 16  ;;  %v45_v21 = vld [vmem:[#allocation2 + $0x8] sm:$0xff] }
  0x89   :  { %v226_v32 = vadd.f32 0.041655596, %v225_v16  ;;  %v372_v8 = vxor.u32 2147483648, %v371_v2  ;;  %v651_v57 = vmul.u32 %v2937_v42, %v597_v48  ;;  %v1373_v9 = vsel %vm1367_vm1, %v1360_v18, 920167782  ;;  %v65_v18 = vld [vmem:[#allocation5 + $0x8] sm:$0xff] }
  0x8a   :  { %v655_v28 = vsel %vm653_vm4, %v654_v7, %v650_v39  ;;  %v3084_v12 = vshrl.u32 %v3068_v55, 16  ;;  %v1383_v20 = vand.u32 65535, %v1379_v34  ;;  %v3087_v46 = vmul.u32 %v1384_v30, %v3078_v56 }
  0x8b   :  { %v234_v49 = vmul.f32 %v233_v25, %v2993_v61  ;;  %v522_v15 = vand.u32 2147483647, %v521_v40  ;;  %v524_v19 = vcvt.s32.f32 %v517_v24  ;;  %vm3092_vm7 = vcmp.le.f32.partialorder %v250_v6, 0.7853982  ;;  %v66_v24 = vld [vmem:[#allocation5 + $0x10] sm:$0xff]  ;;  %v3120_v40 = vld [vmem:[#allocation5 + $0x88] sm:$0xff] }
  0x8c   :  { %v1372_v42 = vsel %vm1364_vm0, %v3075_v4, %v3034_v23  ;;  %v1374_v26 = vsel %vm1366_vm2, %v3036_v37, %v1373_v9  ;;  %v220_v54 = vsub.s32 4, %v2775_v11  ;;  %v227_v39 = vmul.f32 %v226_v32, %v2993_v61 }
  0x8d   :  { %v373_v6 = vsel %vm252_vm5, %v372_v8, %v371_v2  ;;  %v3107_v43 = vadd.s32 %v655_v28, %v651_v57  ;;  %v1385_v51 = vmul.u32 %v1383_v20, %v3078_v56  ;;  %v3111_v14 = vmul.u32 %v1383_v20, %v3084_v12  ;;  %v47_v28 = vld [vmem:[#allocation2 + $0x18] sm:$0xff] }
  0x8e   :  { %v1389_v16 = vshll.u32 %v3087_v46, 16  ;;  %v235_v25 = vadd.f32 -0.16666654, %v234_v49  ;;  %v525_v48 = vmul.f32 %v524_v19, %v522_v15  ;;  %v3116_v7 = vsel %vm1365_vm3, %v1372_v42, %v1374_v26  ;;  %v67_v20 = vld [vmem:[#allocation5 + $0x18] sm:$0xff] }
  0x8f   :  { %v3118_v2 = vsub.f32 %v44_v45, %v64_v36  ;;  %v3125_v34 = vsel %vm3092_vm7, %v3120_v40, %v373_v6  ;;  %v3127_v32 = vsub.f32 %v45_v21, %v65_v18  ;;  %v221_v8 = vsel %vm98_vm6, %v220_v54, %v2775_v11  ;;  %v48_v36 = vld [vmem:[#allocation2 + $0x20] sm:$0xff]  ;;  %v49_v18 = vld [vmem:[#allocation2 + $0x28] sm:$0xff] }
  0x90   :  { %v228_v57 = vadd.f32 -0.4999988, %v227_v39  ;;  %v657_v9 = vadd.s32 536870912, %v3107_v43  ;;  %v1391_v49 = vshll.u32 %v3111_v14, 16  ;;  %vm3134_vm8 = vc.u32 %v1385_v51, %v1389_v16  ;;  %v3150_v39 = vld [vmem:[#allocation5 + $0x90] sm:$0xff] }
  0x91   :  { %4520 = vst [vmem:[#allocation11_spill] sm:$0xff] %v3118_v2  ;;  %v1395_v19 = vadd.s32 %v1389_v16, %v1385_v51  ;;  %v1406_v42 = vshrl.u32 %v3116_v7, 16  ;;  %v3139_v26 = vsub.f32 %v46_v17, %v66_v24  ;;  %v236_v45 = vmul.f32 %v235_v25, %v2993_v61  ;;  %v68_v51 = vld [vmem:[#allocation5 + $0x20] sm:$0xff]  ;;  %v69_v16 = vld [vmem:[#allocation5 + $0x28] sm:$0xff] }
  0x92   :  { %4521 = vst [vmem:[#allocation12_spill] sm:$0xff] %v3127_v32  ;;  %v3144_v0 = vmul.f32 %v3125_v34, %v3125_v34  ;;  %v526_v11 = vxor.u32 2147483648, %v525_v48  ;;  %v3148_v54 = vsel %vm2956_vm9, 0, %v221_v8  ;;  %vm406_vm6 = vcmp.lt.s32.totalorder %v3150_v39, 0  ;;  %v50_v8 = vld [vmem:[#allocation2 + $0x30] sm:$0xff] }
  0x93   :  { %4524 = vst [vmem:[#allocation13_spill] sm:$0xff] %v3139_v26  ;;  %v1388_v6 = vmul.u32 %v1384_v30, %v3084_v12  ;;  %v1405_v21 = vand.u32 65535, %v3116_v7  ;;  %v3155_v25 = vsub.f32 %v47_v28, %v67_v20  ;;  %v229_v17 = vmul.f32 %v228_v57, %v2993_v61 }
  0x94   :  { %v3159_v24 = vand.u32 3, %v3148_v54  ;;  %v1394_v60 = vsel %vm3134_vm8, 1, %v4473_v50  ;;  %vm3166_vm9 = vcmp.le.f32.partialorder %v404_v22, 0.7853982  ;;  %v3170_v7 = vshrl.u32 %v657_v9, 30 }
  0x95   :  { %4525 = vst [vmem:[#allocation14_spill] sm:$0xff] %v3155_v25  ;;  %vm1397_vm10 = vc.u32 %v1395_v19, %v1391_v49  ;;  %v1408_v61 = vmul.u32 %v1406_v42, %v3078_v56  ;;  %v237_v57 = vadd.f32 1.0, %v236_v45  ;;  %v379_v28 = vmul.f32 -0.001358992, %v3144_v0 }
  0x96   :  { %v386_v20 = vmul.f32 -0.00019511016, %v3144_v0  ;;  %v527_v15 = vsel %vm406_vm6, %v526_v11, %v525_v48  ;;  %v3177_v44 = vsub.f32 %v48_v36, %v68_v51  ;;  %v3179_v3 = vsub.f32 %v49_v18, %v69_v16 }
  0x97   :  { %v1396_v22 = vadd.s32 %v1394_v60, %v1388_v6  ;;  %v3182_v35 = vmul.u32 %v1405_v21, %v3084_v12  ;;  %v3184_v9 = vsub.f32 %v50_v8, %v70_v5  ;;  %v3187_v49 = vsub.f32 %v61_v59, %v3120_v40 }
  0x98   :  { %4528 = vst [vmem:[#allocation15_spill] sm:$0xff] %v3177_v44  ;;  %v3189_v19 = vadd.f32 1.0, %v229_v17  ;;  %v1398_v45 = vsel %vm1397_vm10, 1, %v4473_v50  ;;  %v3195_v48 = vsel %vm3166_vm9, %v3150_v39, %v527_v15  ;;  %v659_v11 = vshll.u32 %v3170_v7, 30 }
  0x99   :  { %4529 = vst [vmem:[#allocation16_spill] sm:$0xff] %v3179_v3  ;;  %v1407_v36 = vmul.u32 %v1405_v21, %v3078_v56  ;;  %v1411_v6 = vshll.u32 %v1408_v61, 16  ;;  %v3200_v5 = vmul.f32 %v237_v57, %v2979_v53  ;;  %vm242_vm11 = vcmp.eq.s32.totalorder %v3159_v24, 0 }
  0x9a   :  { %4530 = vst [vmem:[#allocation17_spill] sm:$0xff] %v3184_v9  ;;  %v380_v59 = vadd.f32 0.041655596, %v379_v28  ;;  %v387_v18 = vadd.f32 0.008332121, %v386_v20  ;;  %vm245_vm12 = vcmp.eq.s32.totalorder %v3159_v24, 2  ;;  %v1400_v16 = vadd.s32 %v1398_v45, %v1396_v22 }
  0x9b   :  { %v1390_v51 = vshrl.u32 %v3087_v46, 16  ;;  %v1413_v17 = vshll.u32 %v3182_v35, 16  ;;  %v4476_v60 = vxor.u32 2147483648, %v3189_v19  ;;  %v374_v8 = vsub.s32 4, %v2854_v41 }
  0x9c   :  { %v3210_v56 = vmul.f32 %v3195_v48, %v3195_v48  ;;  %v1410_v53 = vmul.u32 %v1406_v42, %v3084_v12  ;;  %v3214_v21 = vsub.s32 %v3107_v43, %v659_v11  ;;  %v1348_v57 = vshrl.u32 %v4480_v27, %v3001_v47 }
  0x9d   :  { %vm1415_vm13 = vc.u32 %v1407_v36, %v1411_v6  ;;  %v1417_v46 = vadd.s32 %v1411_v6, %v1407_v36  ;;  %v4477_v28 = vxor.u32 2147483648, %v3200_v5  ;;  %v381_v20 = vmul.f32 %v380_v59, %v3144_v0 }
  0x9e   :  { %v388_v15 = vmul.f32 %v387_v18, %v3144_v0  ;;  %v1369_v22 = vsel %vm1367_vm1, %v3036_v37, 2102212464  ;;  %vm241_vm14 = vcmp.lt.s32.totalorder %v3159_v24, 2  ;;  %v1392_v12 = vshrl.u32 %v3111_v14, 16 }
  0x9f   :  { %v1401_v43 = vadd.s32 %v1400_v16, %v1390_v51  ;;  %v1416_v42 = vsel %vm1415_vm13, 1, %v4473_v50  ;;  %vm1419_vm15 = vc.u32 %v1417_v46, %v1413_v17  ;;  %v540_v47 = vmul.f32 -0.00019511016, %v3210_v56 }
  0xa0   :  { %v1412_v45 = vshrl.u32 %v1408_v61, 16  ;;  %v1418_v11 = vadd.s32 %v1416_v42, %v1410_v53  ;;  %v1420_v36 = vsel %vm1419_vm15, 1, %v4473_v50  ;;  %v662_v6 = vsub.s32 0, %v3214_v21 }
  0xa1   :  { %v1368_v37 = vsel %vm1364_vm0, %v1348_v57, %v3075_v4  ;;  %v1370_v14 = vsel %vm1366_vm2, %v3034_v23, %v1369_v22  ;;  %v1489_v59 = vand.u32 2139095040, %v3187_v49  ;;  %v389_v18 = vadd.f32 -0.16666654, %v388_v15 }
  0xa2   :  { %vm661_vm1 = vcmp.lt.s32.totalorder %v3214_v21, 0  ;;  %v1414_v61 = vshrl.u32 %v3182_v35, 16  ;;  %v1422_v51 = vadd.s32 %v1420_v36, %v1418_v11  ;;  %v533_v16 = vmul.f32 -0.001358992, %v3210_v56 }
  0xa3   :  { %v3240_v53 = vadd.s32 %v1401_v43, %v1392_v12  ;;  %v3242_v42 = vadd.s32 %v1417_v46, %v1413_v17  ;;  %v1490_v50 = vshrl.u32 %v1489_v59, 23  ;;  %v375_v4 = vsel %vm252_vm5, %v374_v8, %v2854_v41  ;;  %v62_v8 = vld [vmem:[#allocation2 + $0x90] sm:$0xff]  ;;  %v63_v59 = vld [vmem:[#allocation2 + $0x98] sm:$0xff] }
  0xa4   :  { %v541_v23 = vadd.f32 0.008332121, %v540_v47  ;;  %v1371_v57 = vsel %vm1365_vm3, %v1368_v37, %v1370_v14  ;;  %v1423_v15 = vadd.s32 %v1422_v51, %v1412_v45  ;;  %v244_v35 = vsel %vm242_vm11, %v3189_v19, %v4477_v28  ;;  %v3273_v37 = vld [vmem:[#allocation5 + $0x80] sm:$0xff]  ;;  %v51_v14 = vld [vmem:[#allocation2 + $0x38] sm:$0xff] }
  0xa5   :  { %v247_v17 = vsel %vm245_vm12, %v4476_v60, %v3200_v5  ;;  %v663_v1 = vsel %vm661_vm1, %v662_v6, %v3214_v21  ;;  %v2445_v41 = vadd.s32 4294967169, %v1490_v50  ;;  %v382_v46 = vadd.f32 -0.4999988, %v381_v20 }
  0xa6   :  { %v390_v38 = vmul.f32 %v389_v18, %v3144_v0  ;;  %v528_v22 = vsub.s32 4, %v2894_v62  ;;  %v1424_v12 = vadd.s32 %v1423_v15, %v1414_v61  ;;  %v534_v43 = vadd.f32 0.041655596, %v533_v16 }
  0xa7   :  { %v1425_v47 = vmul.u32 %v3068_v55, %v1371_v57  ;;  %vm1427_vm0 = vc.u32 %v3240_v53, %v3242_v42  ;;  %v1496_v45 = vadd.s32 1, %v2445_v41  ;;  %v3267_v11 = vsel %vm3092_vm7, 0, %v375_v4 }
  0xa8   :  { %v542_v50 = vmul.f32 %v541_v23, %v3210_v56  ;;  %v664_v36 = vclz %v663_v1  ;;  %v1428_v20 = vadd.s32 1, %v1424_v12  ;;  %v3271_v6 = vsub.f32 %v62_v8, %v3150_v39 }
  0xa9   :  { %vm239_vm2 = vweird.f32 %v3273_v37  ;;  %v3277_v55 = vand.u32 3, %v3267_v11  ;;  %vm1497_vm3 = vcmp.gt.s32.totalorder %v1496_v45, 0  ;;  %v248_v18 = vsel %vm241_vm14, %v244_v35, %v247_v17 }
  0xaa   :  { %4531 = vst [vmem:[#allocation18_spill] sm:$0xff] %v3271_v6  ;;  %v529_v61 = vsel %vm406_vm6, %v528_v22, %v2894_v62  ;;  %v1429_v51 = vsel %vm1427_vm0, %v1428_v20, %v1424_v12  ;;  %v1498_v16 = vsel %vm1497_vm3, %v1496_v45, 0  ;;  %v383_v4 = vmul.f32 %v382_v46, %v3144_v0 }
  0xab   :  { %v391_v23 = vadd.f32 1.0, %v390_v38  ;;  %v535_v57 = vmul.f32 %v534_v43, %v3210_v56  ;;  %v1430_v15 = vadd.s32 %v1429_v51, %v1425_v47  ;;  %v543_v1 = vadd.f32 -0.16666654, %v542_v50 }
  0xac   :  { %v2428_v41 = vadd.s32 4294967294, %v664_v36  ;;  %v4475_v24 = vand.u32 2147483647, %v3187_v49  ;;  %v1500_v35 = vand.u32 31, %v1498_v16  ;;  %v3290_v17 = vsub.f32 %v51_v14, %v71_v58 }
  0xad   :  { %v3293_v62 = vsub.f32 %v63_v59, %v2864_v10  ;;  %vm396_vm4 = vcmp.eq.s32.totalorder %v3277_v55, 0  ;;  %v1431_v8 = vadd.s32 536870912, %v1430_v15  ;;  %v3298_v0 = vsel %vm239_vm2, nan, %v248_v18 }
  0xae   :  { %4532 = vst [vmem:[#allocation19_spill] sm:$0xff] %v3290_v17  ;;  %vm399_vm5 = vcmp.eq.s32.totalorder %v3277_v55, 2  ;;  %v3303_v46 = vsel %vm3166_vm9, 0, %v529_v61  ;;  %v3305_v38 = vsub.s32 32, %v1500_v35  ;;  %v3307_v22 = vadd.f32 1.0, %v383_v4 }
  0xaf   :  { %4533 = vst [vmem:[#allocation20_spill] sm:$0xff] %v3298_v0  ;;  %v3310_v12 = vmul.f32 %v391_v23, %v3125_v34  ;;  %v536_v43 = vadd.f32 -0.4999988, %v535_v57  ;;  %v3312_v47 = vshrl.u32 %v1431_v8, 30  ;;  %v544_v45 = vmul.f32 %v543_v1, %v3210_v56 }
  0xb0   :  { %vm2429_vm7 = vcmp.lt.s32.totalorder %v2428_v41, 0  ;;  %v1493_v50 = vand.u32 8388607, %v4475_v24  ;;  %v1643_v30 = vand.u32 2139095040, %v3271_v6  ;;  %vm395_vm8 = vcmp.lt.s32.totalorder %v3277_v55, 2 }
  0xb1   :  { %v1433_v36 = vshll.u32 %v3312_v47, 30  ;;  %v3320_v20 = vshrl.u32 %v1498_v16, 5  ;;  %v1503_v34 = vshll.u32 %v4480_v27, %v1500_v35  ;;  %v1506_v14 = vshll.u32 %v4478_v29, %v1500_v35 }
  0xb2   :  { %v1504_v59 = vshrl.u32 %v4478_v29, %v3305_v38  ;;  %v1507_v58 = vshrl.u32 %v4482_v31, %v3305_v38  ;;  %v1512_v18 = vshll.u32 %v4485_v33, %v1500_v35  ;;  %v4534_v61 = vmov 920167782  }
  0xb3   :  { %v1513_v51 = vshrl.u32 %v4534_v61, %v3305_v38  ;;  %v3332_v23 = vsub.s32 %v1430_v15, %v1433_v36  ;;  %v1509_v16 = vshll.u32 %v4482_v31, %v1500_v35  ;;  %v1510_v57 = vshrl.u32 %v4485_v33, %v3305_v38 }
  0xb4   :  { %v537_v8 = vmul.f32 %v536_v43, %v3210_v56  ;;  %v1515_v24 = vshll.u32 %v4534_v61, %v1500_v35  ;;  %v4535_v60 = vmov 1326507024   ;;  %v545_v29 = vadd.f32 1.0, %v544_v45 }
  0xb5   :  { %v1516_v28 = vshrl.u32 %v4535_v60, %v3305_v38  ;;  %v3343_v27 = vsel %vm2429_vm7, 0, %v2428_v41  ;;  %v1494_v15 = vor.u32 8388608, %v1493_v50  ;;  %v1644_v36 = vshrl.u32 %v1643_v30, 23 }
  0xb6   :  { %v1505_v4 = vor.u32 %v1504_v59, %v1503_v34  ;;  %v1508_v31 = vor.u32 %v1507_v58, %v1506_v14  ;;  %v1514_v17 = vor.u32 %v1513_v51, %v1512_v18  ;;  %vm1518_vm6 = vcmp.lt.s32.totalorder %v3320_v20, 1 }
  0xb7   :  { %v1436_v33 = vsub.s32 0, %v3332_v23  ;;  %v1511_v1 = vor.u32 %v1510_v57, %v1509_v16  ;;  %v1517_v56 = vor.u32 %v1516_v28, %v1515_v24  ;;  %vm1521_vm9 = vcmp.lt.s32.totalorder %v3320_v20, 4 }
  0xb8   :  { %v4536_v35 = vxor.u32 2147483648, %v3310_v12  ;;  %v4537_v43 = vxor.u32 2147483648, %v3307_v22  ;;  %vm1435_vm10 = vcmp.lt.s32.totalorder %v3332_v23, 0  ;;  %vm1520_vm11 = vcmp.lt.s32.totalorder %v3320_v20, 3 }
  0xb9   :  { %v3360_v50 = vadd.f32 1.0, %v537_v8  ;;  %vm1519_vm12 = vcmp.lt.s32.totalorder %v3320_v20, 2  ;;  %v3363_v28 = vshll.u32 %v1494_v15, 8  ;;  %v2448_v24 = vadd.s32 4294967169, %v1644_v36 }
  0xba   :  { %v398_v41 = vsel %vm396_vm4, %v3307_v22, %v4536_v35  ;;  %v401_v45 = vsel %vm399_vm5, %v4537_v43, %v3310_v12  ;;  %v3366_v30 = vmul.f32 %v545_v29, %v3195_v48  ;;  %v672_v34 = vsub.s32 4294967266, %v3343_v27 }
  0xbb   :  { %v1526_v14 = vsel %vm1518_vm6, %v1505_v4, %v1508_v31  ;;  %v1527_v59 = vsel %vm1521_vm9, %v1514_v17, 920167782  ;;  %v1437_v58 = vsel %vm1435_vm10, %v1436_v33, %v3332_v23  ;;  %v1530_v51 = vsel %vm1518_vm6, %v1508_v31, %v1511_v1 }
  0xbc   :  { %v1528_v18 = vsel %vm1520_vm11, %v1511_v1, %v1527_v59  ;;  %v1531_v29 = vsel %vm1521_vm9, %v1517_v56, 1326507024  ;;  %v3382_v48 = vsel %vm395_vm8, %v398_v41, %v401_v45  ;;  %v3385_v16 = vand.u32 3, %v3303_v46 }
  0xbd   :  { %v1529_v57 = vsel %vm1519_vm12, %v1526_v14, %v1528_v18  ;;  %v1532_v33 = vsel %vm1520_vm11, %v1514_v17, %v1531_v29  ;;  %v652_v15 = vadd.s32 %v3051_v52, %v3049_v13  ;;  %v1535_v36 = vand.u32 65535, %v3363_v28 }
  0xbe   :  { %v1650_v56 = vadd.s32 1, %v2448_v24  ;;  %v1438_v55 = vclz %v1437_v58  ;;  %v1533_v35 = vsel %vm1519_vm12, %v1530_v51, %v1532_v33  ;;  %v1536_v41 = vshrl.u32 %v3363_v28, 16 }
  0xbf   :  { %v1560_v43 = vshrl.u32 %v1529_v57, 16  ;;  %v668_v14 = vsub.s32 32, %v3343_v27  ;;  %v673_v17 = vadd.s32 127, %v672_v34  ;;  %v1559_v59 = vand.u32 65535, %v1529_v57 }
  0xc0   :  { %v669_v18 = vshll.u32 %v3214_v21, %v3343_v27  ;;  %v1537_v52 = vand.u32 65535, %v1533_v35  ;;  %v1538_v24 = vshrl.u32 %v1533_v35, 16  ;;  %v4538_v58 = vmov 683565275  }
  0xc1   :  { %v1502_v29 = vshrl.u32 %v4538_v58, %v3305_v38  ;;  %v1523_v51 = vsel %vm1521_vm9, %v1511_v1, 2102212464  ;;  %v1562_v33 = vmul.u32 %v1560_v43, %v1535_v36  ;;  %vm1651_vm13 = vcmp.gt.s32.totalorder %v1650_v56, 0 }
  0xc2   :  { %v2443_v8 = vadd.s32 4294967294, %v1438_v55  ;;  %v1539_v45 = vmul.u32 %v1537_v52, %v1535_v36  ;;  %v1540_v25 = vmul.u32 %v1538_v24, %v1535_v36  ;;  %v1541_v34 = vmul.u32 %v1537_v52, %v1536_v41 }
  0xc3   :  { %v670_v57 = vshrl.u32 %v652_v15, %v668_v14  ;;  %v674_v9 = vshll.u32 %v673_v17, 23  ;;  %v1561_v3 = vmul.u32 %v1559_v59, %v1535_v36  ;;  %v1563_v27 = vmul.u32 %v1559_v59, %v1536_v41 }
  0xc4   :  { %v1542_v21 = vmul.u32 %v1538_v24, %v1536_v41  ;;  %v1543_v13 = vshll.u32 %v1540_v25, 16  ;;  %v1545_v44 = vshll.u32 %v1541_v34, 16  ;;  %v1652_v35 = vsel %vm1651_vm13, %v1650_v56, 0 }
  0xc5   :  { %v1522_v38 = vsel %vm1518_vm6, %v1502_v29, %v1505_v4  ;;  %v1524_v1 = vsel %vm1520_vm11, %v1508_v31, %v1523_v51  ;;  %v1564_v26 = vmul.u32 %v1560_v43, %v1536_v41  ;;  %v1565_v32 = vshll.u32 %v1562_v33, 16 }
  0xc6   :  { %vm2444_vm14 = vcmp.lt.s32.totalorder %v2443_v8, 0  ;;  %vm1547_vm15 = vc.u32 %v1539_v45, %v1543_v13  ;;  %v1549_v55 = vadd.s32 %v1543_v13, %v1539_v45  ;;  %v1567_v52 = vshll.u32 %v1563_v27, 16 }
  0xc7   :  { %v1544_v15 = vshrl.u32 %v1540_v25, 16  ;;  %v4539_v14 = vmov 0   ;;  %vm1569_vm1 = vc.u32 %v1561_v3, %v1565_v32  ;;  %v1571_v17 = vadd.s32 %v1565_v32, %v1561_v3 }
  0xc8   :  { %v1548_v36 = vsel %vm1547_vm15, 1, %v4539_v14  ;;  %vm1551_vm0 = vc.u32 %v1549_v55, %v1545_v44  ;;  %v1570_v56 = vsel %vm1569_vm1, 1, %v4539_v14  ;;  %v1654_v24 = vand.u32 31, %v1652_v35 }
  0xc9   :  { %v1550_v59 = vadd.s32 %v1548_v36, %v1542_v21  ;;  %v1552_v4 = vsel %vm1551_vm0, 1, %v4539_v14  ;;  %v1566_v29 = vshrl.u32 %v1562_v33, 16  ;;  %v1572_v31 = vadd.s32 %v1570_v56, %v1564_v26 }
  0xca   :  { %vm1573_vm3 = vc.u32 %v1571_v17, %v1567_v52  ;;  %vm550_vm4 = vcmp.eq.s32.totalorder %v3385_v16, 0  ;;  %vm553_vm5 = vcmp.eq.s32.totalorder %v3385_v16, 2  ;;  %v1546_v41 = vshrl.u32 %v1541_v34, 16 }
  0xcb   :  { %v1554_v25 = vadd.s32 %v1552_v4, %v1550_v59  ;;  %v1574_v43 = vsel %vm1573_vm3, 1, %v4539_v14  ;;  %v3417_v45 = vsub.s32 32, %v1654_v24  ;;  %v671_v32 = vor.u32 %v670_v57, %v669_v18 }
  0xcc   :  { %v675_v44 = vor.u32 4788187, %v674_v9  ;;  %v1568_v3 = vshrl.u32 %v1563_v27, 16  ;;  %v1576_v13 = vadd.s32 %v1574_v43, %v1572_v31  ;;  %vm560_vm7 = vcmp.lt.s32.totalorder %v2864_v10, 0 }
  0xcd   :  { %v1525_v26 = vsel %vm1519_vm12, %v1522_v38, %v1524_v1  ;;  %v1555_v51 = vadd.s32 %v1554_v25, %v1544_v15  ;;  %v3422_v33 = vadd.s32 %v1571_v17, %v1567_v52  ;;  %v4494_v21 = vand.u32 2147483647, %v3271_v6 }
  0xce   :  { %v3426_v34 = vsel %vm2444_vm14, 0, %v2443_v8  ;;  %v1577_v55 = vadd.s32 %v1576_v13, %v1566_v29  ;;  %v3428_v36 = vshrl.u32 %v1652_v35, 5  ;;  %v1657_v9 = vshll.u32 %v4538_v58, %v1654_v24 }
  0xcf   :  { %vm549_vm8 = vcmp.lt.s32.totalorder %v3385_v16, 2  ;;  %v3432_v18 = vadd.s32 %v1555_v51, %v1546_v41  ;;  %v4540_v20 = vmov 2475754826   ;;  %v4541_v38 = vmov 2131351028  }
  0xd0   :  { %v1658_v57 = vshrl.u32 %v4540_v20, %v3417_v45  ;;  %v1660_v27 = vshll.u32 %v4540_v20, %v1654_v24  ;;  %v1661_v1 = vshrl.u32 %v4541_v38, %v3417_v45  ;;  %v1578_v52 = vadd.s32 %v1577_v55, %v1568_v3 }
  0xd1   :  { %v1663_v8 = vshll.u32 %v4541_v38, %v1654_v24  ;;  %v4542_v35 = vmov 2102212464   ;;  %v4543_v59 = vand.u32 2147483647, %v2864_v10  ;;  %v1579_v4 = vmul.u32 %v3363_v28, %v1525_v26 }
  0xd2   :  { %v1664_v15 = vshrl.u32 %v4542_v35, %v3417_v45  ;;  %v1666_v17 = vshll.u32 %v4542_v35, %v1654_v24  ;;  %vm1581_vm9 = vc.u32 %v3432_v18, %v3422_v33  ;;  %v1667_v29 = vshrl.u32 %v4534_v61, %v3417_v45 }
  0xd3   :  { %vm3445_vm6 = vcmp.le.f32.partialorder %v4543_v59, 0.7853982  ;;  %v1669_v31 = vshll.u32 %v4534_v61, %v1654_v24  ;;  %v678_v41 = vcvt.s32.f32 %v671_v32  ;;  %v1582_v25 = vadd.s32 1, %v1578_v52 }
  0xd4   :  { %v1647_v43 = vand.u32 8388607, %v4494_v21  ;;  %v1670_v3 = vshrl.u32 %v4535_v60, %v3417_v45  ;;  %v676_v13 = vand.u32 2147483647, %v675_v44  ;;  %v1446_v51 = vsub.s32 4294967266, %v3426_v34 }
  0xd5   :  { %v3460_v28 = vor.u32 %v1658_v57, %v1657_v9  ;;  %v1668_v26 = vor.u32 %v1667_v29, %v1666_v17  ;;  %v1583_v55 = vsel %vm1581_vm9, %v1582_v25, %v1578_v52  ;;  %v3462_v59 = vor.u32 %v1661_v1, %v1660_v27 }
  0xd6   :  { %v3464_v0 = vor.u32 %v1664_v15, %v1663_v8  ;;  %vm1672_vm10 = vcmp.lt.s32.totalorder %v3428_v36, 1  ;;  %v1584_v24 = vadd.s32 %v1583_v55, %v1579_v4  ;;  %v1671_v32 = vor.u32 %v1670_v3, %v1669_v31 }
  0xd7   :  { %vm1674_vm11 = vcmp.lt.s32.totalorder %v3428_v36, 3  ;;  %vm1675_vm12 = vcmp.lt.s32.totalorder %v3428_v36, 4  ;;  %v4546_v44 = vxor.u32 2147483648, %v3366_v30  ;;  %v4547_v57 = vxor.u32 2147483648, %v3360_v50 }
  0xd8   :  { %v4548_v1 = vsub.s32 4, %v3170_v7  ;;  %v1648_v8 = vor.u32 8388608, %v1647_v43  ;;  %v679_v15 = vmul.f32 %v678_v41, %v676_v13  ;;  %v1426_v17 = vadd.s32 %v3242_v42, %v3240_v53 }
  0xd9   :  { %v552_v9 = vsel %vm550_vm4, %v3360_v50, %v4546_v44  ;;  %v555_v27 = vsel %vm553_vm5, %v4547_v57, %v3366_v30  ;;  %v1585_v4 = vadd.s32 536870912, %v1584_v24  ;;  %v1681_v29 = vsel %vm1675_vm12, %v1668_v26, 920167782 }
  0xda   :  { %v683_v52 = vsel %vm560_vm7, %v4548_v1, %v3170_v7  ;;  %v1442_v31 = vsub.s32 32, %v3426_v34  ;;  %vm1673_vm13 = vcmp.lt.s32.totalorder %v3428_v36, 2  ;;  %v1680_v25 = vsel %vm1672_vm10, %v3460_v28, %v3462_v59 }
  0xdb   :  { %v1682_v7 = vsel %vm1674_vm11, %v3464_v0, %v1681_v29  ;;  %v1447_v41 = vadd.s32 127, %v1446_v51  ;;  %v3497_v43 = vshrl.u32 %v1585_v4, 30  ;;  %v1684_v53 = vsel %vm1672_vm10, %v3462_v59, %v3464_v0 }
  0xdc   :  { %v1685_v42 = vsel %vm1675_vm12, %v1671_v32, 1326507024  ;;  %v3507_v3 = vsel %vm549_vm8, %v552_v9, %v555_v27  ;;  %v3511_v13 = vsel %vm3445_vm6, 0, %v683_v52  ;;  %v3515_v55 = vshll.u32 %v1648_v8, 8 }
  0xdd   :  { %4549 = vst [vmem:[#allocation21_spill] sm:$0xff] %v3497_v43  ;;  %v1686_v51 = vsel %vm1674_vm11, %v1668_v26, %v1685_v42  ;;  %v680_v44 = vxor.u32 2147483648, %v679_v15  ;;  %v1587_v57 = vshll.u32 %v3497_v43, 30  ;;  %v1683_v1 = vsel %vm1673_vm13, %v1680_v25, %v1682_v7 }
  0xde   :  { %v1687_v16 = vsel %vm1673_vm13, %v1684_v53, %v1686_v51  ;;  %v1443_v32 = vshll.u32 %v3332_v23, %v3426_v34  ;;  %v1444_v9 = vshrl.u32 %v1426_v17, %v1442_v31  ;;  %v1689_v27 = vand.u32 65535, %v3515_v55 }
  0xdf   :  { %v1690_v52 = vshrl.u32 %v3515_v55, 16  ;;  %v1448_v26 = vshll.u32 %v1447_v41, 23  ;;  %v3526_v8 = vsub.s32 %v1584_v24, %v1587_v57  ;;  %v1691_v4 = vand.u32 65535, %v1687_v16 }
  0xe0   :  { %v1692_v29 = vshrl.u32 %v1687_v16, 16  ;;  %v856_v42 = vadd.s32 3, %v3148_v54  ;;  %v1011_v25 = vadd.s32 3, %v3267_v11  ;;  %v1166_v7 = vadd.s32 3, %v3303_v46 }
  0xe1   :  { %v1714_v53 = vshrl.u32 %v1683_v1, 16  ;;  %vm1589_vm14 = vcmp.lt.s32.totalorder %v3526_v8, 0  ;;  %v1590_v23 = vsub.s32 0, %v3526_v8  ;;  %v1693_v34 = vmul.u32 %v1691_v4, %v1689_v27 }
  0xe2   :  { %v1694_v17 = vmul.u32 %v1692_v29, %v1689_v27  ;;  %v681_v31 = vsel %vm560_vm7, %v680_v44, %v679_v15  ;;  %v1445_v24 = vor.u32 %v1444_v9, %v1443_v32  ;;  %v3535_v41 = vmul.u32 %v1691_v4, %v1690_v52  ;;  %v3545_v44 = vld [vmem:[#allocation5 + $0x98] sm:$0xff] }
  0xe3   :  { %v1713_v51 = vand.u32 65535, %v1683_v1  ;;  %v1449_v57 = vor.u32 4788187, %v1448_v26  ;;  %v1591_v54 = vsel %vm1589_vm14, %v1590_v23, %v3526_v8  ;;  %v1696_v11 = vmul.u32 %v1692_v29, %v1690_v52 }
  0xe4   :  { %v1697_v16 = vshll.u32 %v1694_v17, 16  ;;  %v3538_v46 = vand.u32 3, %v856_v42  ;;  %v3540_v21 = vand.u32 3, %v1011_v25  ;;  %v1592_v2 = vclz %v1591_v54 }
  0xe5   :  { %v1699_v43 = vshll.u32 %v3535_v41, 16  ;;  %v3543_v6 = vand.u32 3, %v1166_v7  ;;  %v1716_v15 = vmul.u32 %v1714_v53, %v1689_v27  ;;  %v3550_v1 = vsel %vm3445_vm6, %v3545_v44, %v681_v31 }
  0xe6   :  { %vm1701_vm15 = vc.u32 %v1693_v34, %v1697_v16  ;;  %v1703_v10 = vadd.s32 %v1697_v16, %v1693_v34  ;;  %v2446_v32 = vadd.s32 4294967294, %v1592_v2  ;;  %v3553_v26 = vmul.u32 %v1713_v51, %v1690_v52 }
  0xe7   :  { %v1702_v9 = vsel %vm1701_vm15, 1, %v4539_v14  ;;  %v1450_v4 = vand.u32 2147483647, %v1449_v57  ;;  %v1452_v29 = vcvt.s32.f32 %v1445_v24  ;;  %vm859_vm0 = vcmp.eq.s32.totalorder %v3538_v46, 0 }
  0xe8   :  { %v1704_v42 = vadd.s32 %v1702_v9, %v1696_v11  ;;  %vm1705_vm1 = vc.u32 %v1703_v10, %v1699_v43  ;;  %vm862_vm3 = vcmp.eq.s32.totalorder %v3538_v46, 2  ;;  %vm2447_vm4 = vcmp.lt.s32.totalorder %v2446_v32, 0 }
  0xe9   :  { %v1706_v25 = vsel %vm1705_vm1, 1, %v4539_v14  ;;  %v1715_v7 = vmul.u32 %v1713_v51, %v1689_v27  ;;  %v1719_v56 = vshll.u32 %v1716_v15, 16  ;;  %v1580_v2 = vadd.s32 %v3422_v33, %v3432_v18 }
  0xea   :  { %v1595_v23 = vsel %vm2447_vm4, 0, %v2446_v32  ;;  %v1698_v34 = vshrl.u32 %v1694_v17, 16  ;;  %v1708_v31 = vadd.s32 %v1706_v25, %v1704_v42  ;;  %v1718_v24 = vmul.u32 %v1714_v53, %v1690_v52 }
  0xeb   :  { %v1596_v54 = vsub.s32 32, %v1595_v23  ;;  %v1600_v57 = vsub.s32 4294967266, %v1595_v23  ;;  %v1721_v43 = vshll.u32 %v3553_v26, 16  ;;  %v3563_v11 = vmul.f32 %v3550_v1, %v3550_v1 }
  0xec   :  { %vm1334_vm5 = vcmp.lt.s32.totalorder %v2892_v63, 0  ;;  %v1453_v16 = vmul.f32 %v1452_v29, %v1450_v4  ;;  %v1656_v27 = vshrl.u32 %v4538_v58, %v3417_v45  ;;  %v1677_v33 = vsel %vm1675_vm12, %v3464_v0, 2102212464 }
  0xed   :  { %v1601_v18 = vadd.s32 127, %v1600_v57  ;;  %v1700_v17 = vshrl.u32 %v3535_v41, 16  ;;  %vm1723_vm7 = vc.u32 %v1715_v7, %v1719_v56  ;;  %v1725_v52 = vadd.s32 %v1719_v56, %v1715_v7 }
  0xee   :  { %v1597_v53 = vshll.u32 %v3526_v8, %v1595_v23  ;;  %v1709_v51 = vadd.s32 %v1708_v31, %v1698_v34  ;;  %v1720_v10 = vshrl.u32 %v1716_v15, 16  ;;  %v1724_v32 = vsel %vm1723_vm7, 1, %v4539_v14 }
  0xef   :  { %v4550_v9 = vand.u32 2147483647, %v2892_v63  ;;  %v1598_v45 = vshrl.u32 %v1580_v2, %v1596_v54  ;;  %v1602_v29 = vshll.u32 %v1601_v18, 23  ;;  %v1726_v0 = vadd.s32 %v1724_v32, %v1718_v24 }
  0xf0   :  { %vm1727_vm6 = vc.u32 %v1725_v52, %v1721_v43  ;;  %vm393_vm9 = vweird.f32 %v3120_v40  ;;  %vm547_vm12 = vweird.f32 %v3150_v39  ;;  %v1676_v8 = vsel %vm1672_vm10, %v1656_v27, %v3460_v28 }
  0xf1   :  { %vm3576_vm8 = vcmp.le.f32.partialorder %v4550_v9, 0.7853982  ;;  %v1678_v41 = vsel %vm1674_vm11, %v3462_v59, %v1677_v33  ;;  %v1728_v15 = vsel %vm1727_vm6, 1, %v4539_v14  ;;  %v1797_v42 = vand.u32 2139095040, %v3293_v62 }
  0xf2   :  { %v694_v25 = vmul.f32 -0.00019511016, %v3563_v11  ;;  %vm858_vm14 = vcmp.lt.s32.totalorder %v3538_v46, 2  ;;  %v1722_v7 = vshrl.u32 %v3553_v26, 16  ;;  %v1730_v56 = vadd.s32 %v1728_v15, %v1726_v0 }
  0xf3   :  { %v1454_v2 = vxor.u32 2147483648, %v1453_v16  ;;  %v3593_v23 = vadd.s32 %v1709_v51, %v1700_v17  ;;  %v3595_v34 = vadd.s32 %v1725_v52, %v1721_v43  ;;  %v1798_v28 = vshrl.u32 %v1797_v42, 23 }
  0xf4   :  { %v1599_v31 = vor.u32 %v1598_v45, %v1597_v53  ;;  %v1603_v54 = vor.u32 4788187, %v1602_v29  ;;  %v1679_v59 = vsel %vm1673_vm13, %v1676_v8, %v1678_v41  ;;  %v1731_v57 = vadd.s32 %v1730_v56, %v1720_v10 }
  0xf5   :  { %v4553_v24 = vxor.u32 2147483648, %v3200_v5  ;;  %v4554_v26 = vxor.u32 2147483648, %v3189_v19  ;;  %vm1013_vm10 = vcmp.lt.s32.totalorder %v3540_v21, 2  ;;  %v2451_v33 = vadd.s32 4294967169, %v1798_v28 }
  0xf6   :  { %v687_v18 = vmul.f32 -0.001358992, %v3563_v11  ;;  %vm1014_vm11 = vcmp.eq.s32.totalorder %v3540_v21, 0  ;;  %vm1017_vm13 = vcmp.eq.s32.totalorder %v3540_v21, 2  ;;  %v1732_v36 = vadd.s32 %v1731_v57, %v1722_v7 }
  0xf7   :  { %v861_v27 = vsel %vm859_vm0, %v3189_v19, %v4553_v24  ;;  %v864_v43 = vsel %vm862_vm3, %v4554_v26, %v3200_v5  ;;  %v695_v17 = vadd.f32 0.008332121, %v694_v25  ;;  %v1733_v52 = vmul.u32 %v3515_v55, %v1679_v59 }
  0xf8   :  { %vm1735_vm15 = vc.u32 %v3593_v23, %v3595_v34  ;;  %v1804_v19 = vadd.s32 1, %v2451_v33  ;;  %v1455_v5 = vsel %vm1334_vm5, %v1454_v2, %v1453_v16  ;;  %v1604_v53 = vand.u32 2147483647, %v1603_v54 }
  0xf9   :  { %v1606_v51 = vcvt.s32.f32 %v1599_v31  ;;  %v1736_v10 = vadd.s32 1, %v1732_v36  ;;  %v865_v32 = vsel %vm858_vm14, %v861_v27, %v864_v43  ;;  %v4555_v9 = vxor.u32 2147483648, %v3310_v12 }
  0xfa   :  { %v4556_v55 = vxor.u32 2147483648, %v3307_v22  ;;  %vm1805_vm1 = vcmp.gt.s32.totalorder %v1804_v19, 0  ;;  %v688_v0 = vadd.f32 0.041655596, %v687_v18  ;;  %vm1169_vm0 = vcmp.eq.s32.totalorder %v3543_v6, 0 }
  0xfb   :  { %v1016_v45 = vsel %vm1014_vm11, %v3307_v22, %v4555_v9  ;;  %v1737_v8 = vsel %vm1735_vm15, %v1736_v10, %v1732_v36  ;;  %v1806_v16 = vsel %vm1805_vm1, %v1804_v19, 0  ;;  %v696_v41 = vmul.f32 %v695_v17, %v3563_v11 }
  0xfc   :  { %v1019_v29 = vsel %vm1017_vm13, %v4556_v55, %v3310_v12  ;;  %v3631_v46 = vsel %vm3576_vm8, %v2892_v63, %v1455_v5  ;;  %v1738_v15 = vadd.s32 %v1737_v8, %v1733_v52  ;;  %v1808_v42 = vand.u32 31, %v1806_v16 }
  0xfd   :  { %v3636_v22 = vsel %vm393_vm9, nan, %v3382_v48  ;;  %v3641_v12 = vsel %vm547_vm12, nan, %v3507_v3  ;;  %v1607_v25 = vmul.f32 %v1606_v51, %v1604_v53  ;;  %v4500_v7 = vand.u32 2147483647, %v3293_v62 }
  0xfe   :  { %4557 = vst [vmem:[#allocation22_spill] sm:$0xff] %v3641_v12  ;;  %v3645_v56 = vand.u32 3, %v3511_v13  ;;  %v3648_v2 = vadd.s32 3, %v3511_v13  ;;  %v1739_v28 = vadd.s32 536870912, %v1738_v15  ;;  %v3650_v31 = vsub.s32 32, %v1808_v42 }
  0xff   :  { %v3654_v48 = vsel %vm239_vm2, nan, %v865_v32  ;;  %v3658_v3 = vsel %vm1013_vm10, %v1016_v45, %v1019_v29  ;;  %v4559_v54 = vxor.u32 2147483648, %v3366_v30  ;;  %v3669_v13 = vmul.f32 %v3631_v46, %v3631_v46 }
 0x100   :  { %4558 = vst [vmem:[#allocation23_spill] sm:$0xff] %v3654_v48  ;;  %v689_v57 = vmul.f32 %v688_v0, %v3563_v11  ;;  %v697_v37 = vadd.f32 -0.16666654, %v696_v41  ;;  %vm1488_vm2 = vcmp.lt.s32.totalorder %v3187_v49, 0  ;;  %v3673_v24 = vshrl.u32 %v1739_v28, 30 }
 0x101   :  { %v3665_v59 = vsel %vm1169_vm0, %v3360_v50, %v4559_v54  ;;  %v1461_v21 = vmul.f32 -0.001358992, %v3669_v13  ;;  %v1608_v27 = vxor.u32 2147483648, %v1607_v25  ;;  %v1801_v26 = vand.u32 8388607, %v4500_v7 }
 0x102   :  { %v3678_v43 = vshrl.u32 %v1806_v16, 5  ;;  %v1741_v33 = vshll.u32 %v3673_v24, 30  ;;  %v1811_v18 = vshll.u32 %v4538_v58, %v1808_v42  ;;  %v1820_v36 = vshll.u32 %v4542_v35, %v1808_v42 }
 0x103   :  { %v1821_v17 = vshrl.u32 %v4534_v61, %v3650_v31  ;;  %v1812_v52 = vshrl.u32 %v4540_v20, %v3650_v31  ;;  %v1814_v19 = vshll.u32 %v4540_v20, %v1808_v42  ;;  %v1815_v5 = vshrl.u32 %v4541_v38, %v3650_v31 }
 0x104   :  { %v1817_v53 = vshll.u32 %v4541_v38, %v1808_v42  ;;  %v3691_v51 = vsub.s32 %v1738_v15, %v1741_v33  ;;  %v1818_v10 = vshrl.u32 %v4542_v35, %v3650_v31  ;;  %v1823_v32 = vshll.u32 %v4534_v61, %v1808_v42 }
 0x105   :  { %v1824_v9 = vshrl.u32 %v4535_v60, %v3650_v31  ;;  %v1462_v45 = vadd.f32 0.041655596, %v1461_v21  ;;  %v1468_v55 = vmul.f32 -0.00019511016, %v3669_v13  ;;  %v4560_v20 = vand.u32 2147483647, %v3187_v49 }
 0x106   :  { %v1609_v38 = vsel %vm1488_vm2, %v1608_v27, %v1607_v25  ;;  %vm1743_vm4 = vcmp.lt.s32.totalorder %v3691_v51, 0  ;;  %v1744_v35 = vsub.s32 0, %v3691_v51  ;;  %v1822_v61 = vor.u32 %v1821_v17, %v1820_v36 }
 0x107   :  { %vm3701_vm3 = vcmp.le.f32.partialorder %v4560_v20, 0.7853982  ;;  %v1825_v0 = vor.u32 %v1824_v9, %v1823_v32  ;;  %v1802_v8 = vor.u32 8388608, %v1801_v26  ;;  %v1813_v60 = vor.u32 %v1812_v52, %v1811_v18 }
 0x108   :  { %v3709_v16 = vor.u32 %v1815_v5, %v1814_v19  ;;  %vm1829_vm7 = vcmp.lt.s32.totalorder %v3678_v43, 4  ;;  %v690_v41 = vadd.f32 -0.4999988, %v689_v57  ;;  %v1745_v15 = vsel %vm1743_vm4, %v1744_v35, %v3691_v51 }
 0x109   :  { %v1819_v42 = vor.u32 %v1818_v10, %v1817_v53  ;;  %vm1826_vm6 = vcmp.lt.s32.totalorder %v3678_v43, 1  ;;  %v698_v25 = vmul.f32 %v697_v37, %v3563_v11  ;;  %v3718_v28 = vsel %vm3701_vm3, %v3187_v49, %v1609_v38 }
 0x10a   :  { %v1746_v54 = vclz %v1745_v15  ;;  %vm1828_vm14 = vcmp.lt.s32.totalorder %v3678_v43, 3  ;;  %v1463_v21 = vmul.f32 %v1462_v45, %v3669_v13  ;;  %v1469_v27 = vadd.f32 0.008332121, %v1468_v55 }
 0x10b   :  { %v1835_v57 = vsel %vm1829_vm7, %v1822_v61, 920167782  ;;  %v1839_v26 = vsel %vm1829_vm7, %v1825_v0, 1326507024  ;;  %vm1827_vm10 = vcmp.lt.s32.totalorder %v3678_v43, 2  ;;  %v1834_v37 = vsel %vm1826_vm6, %v1813_v60, %v3709_v16 }
 0x10c   :  { %v2449_v33 = vadd.s32 4294967294, %v1746_v54  ;;  %v3730_v18 = vshll.u32 %v1802_v8, 8  ;;  %v3734_v36 = vmul.f32 %v3718_v28, %v3718_v28  ;;  %v1836_v17 = vsel %vm1828_vm14, %v1819_v42, %v1835_v57 }
 0x10d   :  { %v1838_v52 = vsel %vm1826_vm6, %v3709_v16, %v1819_v42  ;;  %v1840_v19 = vsel %vm1828_vm14, %v1822_v61, %v1839_v26  ;;  %v3744_v5 = vmul.f32 %v690_v41, %v3563_v11  ;;  %v3746_v53 = vadd.f32 1.0, %v698_v25 }
 0x10e   :  { %v1734_v10 = vadd.s32 %v3595_v34, %v3593_v23  ;;  %vm2450_vm11 = vcmp.lt.s32.totalorder %v2449_v33, 0  ;;  %v1470_v32 = vmul.f32 %v1469_v27, %v3669_v13  ;;  %v1837_v45 = vsel %vm1827_vm10, %v1834_v37, %v1836_v17 }
 0x10f   :  { %v1749_v9 = vsel %vm2450_vm11, 0, %v2449_v33  ;;  %v1844_v55 = vshrl.u32 %v3730_v18, 16  ;;  %v1841_v11 = vsel %vm1827_vm10, %v1838_v52, %v1840_v19  ;;  %v3758_v0 = vadd.f32 -0.4999988, %v1463_v21 }
 0x110   :  { %v1750_v20 = vsub.s32 32, %v1749_v9  ;;  %v1751_v38 = vshll.u32 %v3691_v51, %v1749_v9  ;;  %v1754_v35 = vsub.s32 4294967266, %v1749_v9  ;;  %v1622_v23 = vmul.f32 -0.00019511016, %v3734_v36  ;;  %v4563_v51 = vld [vmem:[#allocation18_spill] sm:$0xff] }
 0x111   :  { %v1843_v34 = vand.u32 65535, %v3730_v18  ;;  %v1810_v15 = vshrl.u32 %v4538_v58, %v3650_v31  ;;  %v1845_v25 = vand.u32 65535, %v1841_v11  ;;  %v1471_v54 = vadd.f32 -0.16666654, %v1470_v32 }
 0x112   :  { %v1752_v8 = vshrl.u32 %v1734_v10, %v1750_v20  ;;  %v1755_v41 = vadd.s32 127, %v1754_v35  ;;  %vm1642_vm13 = vcmp.lt.s32.totalorder %v4563_v51, 0  ;;  %v1846_v27 = vshrl.u32 %v1841_v11, 16 }
 0x113   :  { %v1867_v57 = vand.u32 65535, %v1837_v45  ;;  %v1868_v26 = vshrl.u32 %v1837_v45, 16  ;;  %v1615_v33 = vmul.f32 -0.001358992, %v3734_v36  ;;  %v4564_v21 = vand.u32 2147483647, %v4563_v51 }
 0x114   :  { %v1753_v17 = vor.u32 %v1752_v8, %v1751_v38  ;;  %v1756_v52 = vshll.u32 %v1755_v41, 23  ;;  %v1849_v19 = vmul.u32 %v1845_v25, %v1844_v55  ;;  %v1623_v10 = vadd.f32 0.008332121, %v1622_v23 }
 0x115   :  { %vm3768_vm15 = vcmp.le.f32.partialorder %v4564_v21, 0.7853982  ;;  %v1847_v58 = vmul.u32 %v1845_v25, %v1843_v34  ;;  %v1848_v31 = vmul.u32 %v1846_v27, %v1843_v34  ;;  %v1870_v32 = vmul.u32 %v1868_v26, %v1843_v34 }
 0x116   :  { %v1757_v9 = vor.u32 4788187, %v1756_v52  ;;  %v1760_v20 = vcvt.s32.f32 %v1753_v17  ;;  %v1830_v45 = vsel %vm1826_vm6, %v1810_v15, %v1813_v60  ;;  %v1869_v35 = vmul.u32 %v1867_v57, %v1843_v34 }
 0x117   :  { %v1850_v11 = vmul.u32 %v1846_v27, %v1844_v55  ;;  %v1851_v7 = vshll.u32 %v1848_v31, 16  ;;  %v1853_v61 = vshll.u32 %v1849_v19, 16  ;;  %v1871_v21 = vmul.u32 %v1867_v57, %v1844_v55 }
 0x118   :  { %v1758_v48 = vand.u32 2147483647, %v1757_v9  ;;  %v1831_v38 = vsel %vm1829_vm7, %v1819_v42, 2102212464  ;;  %v1872_v8 = vmul.u32 %v1868_v26, %v1844_v55  ;;  %v1873_v41 = vshll.u32 %v1870_v32, 16 }
 0x119   :  { %v1852_v23 = vshrl.u32 %v1848_v31, 16  ;;  %vm1855_vm1 = vc.u32 %v1847_v58, %v1851_v7  ;;  %v1857_v25 = vadd.s32 %v1851_v7, %v1847_v58  ;;  %v1875_v12 = vshll.u32 %v1871_v21, 16 }
 0x11a   :  { %v1761_v52 = vmul.f32 %v1760_v20, %v1758_v48  ;;  %v1856_v17 = vsel %vm1855_vm1, 1, %v4539_v14  ;;  %vm1877_vm0 = vc.u32 %v1869_v35, %v1873_v41  ;;  %v1879_v60 = vadd.s32 %v1873_v41, %v1869_v35 }
 0x11b   :  { %v1858_v34 = vadd.s32 %v1856_v17, %v1850_v11  ;;  %vm1859_vm4 = vc.u32 %v1857_v25, %v1853_v61  ;;  %v1874_v15 = vshrl.u32 %v1870_v32, 16  ;;  %v1878_v27 = vsel %vm1877_vm0, 1, %v4539_v14 }
 0x11c   :  { %v1762_v57 = vxor.u32 2147483648, %v1761_v52  ;;  %v1860_v9 = vsel %vm1859_vm4, 1, %v4539_v14  ;;  %v1880_v42 = vadd.s32 %v1878_v27, %v1872_v8  ;;  %vm1881_vm7 = vc.u32 %v1879_v60, %v1875_v12 }
 0x11d   :  { %vm1168_vm6 = vcmp.lt.s32.totalorder %v3543_v6, 2  ;;  %v1832_v7 = vsel %vm1828_vm14, %v3709_v16, %v1831_v38  ;;  %v1854_v48 = vshrl.u32 %v1849_v19, 16  ;;  %v1862_v55 = vadd.s32 %v1860_v9, %v1858_v34  ;;  %v4569_v34 = vld [vmem:[#allocation21_spill] sm:$0xff] }
 0x11e   :  { %v1882_v26 = vsel %vm1881_vm7, 1, %v4539_v14  ;;  %v1472_v61 = vmul.f32 %v1471_v54, %v3669_v13  ;;  %v1763_v58 = vsel %vm1642_vm13, %v1762_v57, %v1761_v52  ;;  %v1876_v31 = vshrl.u32 %v1871_v21, 16 }
 0x11f   :  { %v1884_v32 = vadd.s32 %v1882_v26, %v1880_v42  ;;  %vm704_vm11 = vcmp.eq.s32.totalorder %v3645_v56, 0  ;;  %vm707_vm1 = vcmp.eq.s32.totalorder %v3645_v56, 2  ;;  %v1616_v20 = vadd.f32 0.041655596, %v1615_v33 }
 0x120   :  { %v3792_v16 = vsel %vm3768_vm15, %v4563_v51, %v1763_v58  ;;  %v1863_v19 = vadd.s32 %v1862_v55, %v1852_v23  ;;  %v3794_v35 = vadd.s32 %v1879_v60, %v1875_v12  ;;  %v1624_v14 = vmul.f32 %v1623_v10, %v3734_v36 }
 0x121   :  { %v3799_v54 = vmul.f32 %v3792_v16, %v3792_v16  ;;  %v1833_v11 = vsel %vm1827_vm10, %v1830_v45, %v1832_v7  ;;  %v1885_v21 = vadd.s32 %v1884_v32, %v1874_v15  ;;  %vm1172_vm14 = vcmp.eq.s32.totalorder %v3543_v6, 2 }
 0x122   :  { %v3805_v33 = vand.u32 3, %v3648_v2  ;;  %v4567_v38 = vsub.s32 4, %v3312_v47  ;;  %v3812_v10 = vadd.s32 %v1863_v19, %v1854_v48  ;;  %v692_v8 = vadd.f32 1.0, %v3744_v5 }
 0x123   :  { %v700_v43 = vmul.f32 %v3746_v53, %v3550_v1  ;;  %v1776_v45 = vmul.f32 -0.00019511016, %v3799_v54  ;;  %v1886_v41 = vadd.s32 %v1885_v21, %v1876_v31  ;;  %vm703_vm10 = vcmp.lt.s32.totalorder %v3645_v56, 2 }
 0x124   :  { %v1457_v12 = vsel %vm1334_vm5, %v4567_v38, %v3312_v47  ;;  %v1465_v2 = vmul.f32 %v3758_v0, %v3669_v13  ;;  %v1617_v23 = vmul.f32 %v1616_v20, %v3734_v36  ;;  %v1887_v25 = vmul.u32 %v3730_v18, %v1833_v11 }
 0x125   :  { %vm1889_vm5 = vc.u32 %v3812_v10, %v3794_v35  ;;  %v1459_v47 = vsel %vm3576_vm8, 0, %v1457_v12  ;;  %v1473_v5 = vadd.f32 1.0, %v1472_v61  ;;  %v1625_v1 = vadd.f32 -0.16666654, %v1624_v14 }
 0x126   :  { %v1890_v53 = vadd.s32 1, %v1886_v41  ;;  %v3830_v52 = vsel %vm393_vm9, nan, %v3658_v3  ;;  %v4568_v13 = vxor.u32 2147483648, %v3360_v50  ;;  %v1769_v0 = vmul.f32 -0.001358992, %v3799_v54 }
 0x127   :  { %v1777_v17 = vadd.f32 0.008332121, %v1776_v45  ;;  %v705_v60 = vxor.u32 2147483648, %v700_v43  ;;  %v708_v4 = vxor.u32 2147483648, %v692_v8  ;;  %v1610_v15 = vsub.s32 4, %v4569_v34 }
 0x128   :  { %v1174_v18 = vsel %vm1172_vm14, %v4568_v13, %v3366_v30  ;;  %v1891_v27 = vsel %vm1889_vm5, %v1890_v53, %v1886_v41  ;;  %vm701_vm8 = vweird.f32 %v3545_v44  ;;  %v1466_v57 = vadd.f32 1.0, %v1465_v2  ;;  %v73_v53 = vld [vmem:[#allocation5 + $0x48] sm:$0xff] }
 0x129   :  { %v1476_v40 = vand.u32 3, %v1459_v47  ;;  %v1618_v3 = vadd.f32 -0.4999988, %v1617_v23  ;;  %v1892_v9 = vadd.s32 %v1891_v27, %v1887_v25  ;;  %v1175_v50 = vsel %vm1168_vm6, %v3665_v59, %v1174_v18 }
 0x12a   :  { %vm1323_vm9 = vcmp.lt.s32.totalorder %v3805_v33, 2  ;;  %v1474_v30 = vmul.f32 %v1473_v5, %v3631_v46  ;;  %v1626_v42 = vmul.f32 %v1625_v1, %v3734_v36  ;;  %vm1324_vm0 = vcmp.eq.s32.totalorder %v3805_v33, 0  ;;  %v72_v46 = vld [vmem:[#allocation5 + $0x40] sm:$0xff] }
 0x12b   :  { %v1770_v7 = vadd.f32 0.041655596, %v1769_v0  ;;  %v1778_v48 = vmul.f32 %v1777_v17, %v3799_v54  ;;  %v1893_v55 = vadd.s32 536870912, %v1892_v9  ;;  %v706_v26 = vsel %vm704_vm11, %v692_v8, %v705_v60 }
 0x12c   :  { %v709_v61 = vsel %vm707_vm1, %v708_v4, %v700_v43  ;;  %vm1327_vm4 = vcmp.eq.s32.totalorder %v3805_v33, 2  ;;  %v1611_v6 = vsel %vm1488_vm2, %v1610_v15, %v4569_v34  ;;  %vm1478_vm7 = vcmp.eq.s32.totalorder %v1476_v40, 0  ;;  %v75_v15 = vld [vmem:[#allocation5 + $0x58] sm:$0xff] }
 0x12d   :  { %v1482_v59 = vxor.u32 2147483648, %v1466_v57  ;;  %v1619_v58 = vmul.f32 %v1618_v3, %v3734_v36  ;;  %v3857_v31 = vshrl.u32 %v1893_v55, 30  ;;  %v1479_v32 = vxor.u32 2147483648, %v1474_v30 }
 0x12e   :  { %vm1481_vm6 = vcmp.eq.s32.totalorder %v1476_v40, 2  ;;  %v1627_v20 = vadd.f32 1.0, %v1626_v42  ;;  %v1764_v19 = vsub.s32 4, %v3673_v24  ;;  %v1613_v14 = vsel %vm3701_vm3, 0, %v1611_v6 }
 0x12f   :  { %v1771_v11 = vmul.f32 %v1770_v7, %v3799_v54  ;;  %v1779_v21 = vadd.f32 -0.16666654, %v1778_v48  ;;  %v1895_v38 = vshll.u32 %v3857_v31, 30  ;;  %v710_v12 = vsel %vm703_vm10, %v706_v26, %v709_v61  ;;  %v76_v26 = vld [vmem:[#allocation5 + $0x60] sm:$0xff] }
 0x130   :  { %v1326_v36 = vsel %vm1324_vm0, %v692_v8, %v705_v60  ;;  %v1329_v45 = vsel %vm1327_vm4, %v708_v4, %v700_v43  ;;  %v3870_v41 = vmul.f32 %v72_v46, %v72_v46  ;;  %vm1477_vm2 = vcmp.lt.s32.totalorder %v1476_v40, 2 }
 0x131   :  { %v1483_v2 = vsel %vm1481_vm6, %v1482_v59, %v1474_v30  ;;  %v1620_v29 = vadd.f32 1.0, %v1619_v58  ;;  %v3872_v23 = vsub.s32 %v1892_v9, %v1895_v38  ;;  %v1480_v25 = vsel %vm1478_vm7, %v1466_v57, %v1479_v32  ;;  %v52_v58 = vld [vmem:[#allocation2 + $0x40] sm:$0xff]  ;;  %v53_v32 = vld [vmem:[#allocation2 + $0x48] sm:$0xff] }
 0x132   :  { %4570 = vst [vmem:[#allocation18_spill] sm:$0xff] %v3870_v41  ;;  %v1628_v47 = vmul.f32 %v1627_v20, %v3718_v28  ;;  %v1630_v5 = vand.u32 3, %v1613_v14  ;;  %v1765_v56 = vsel %vm1642_vm13, %v1764_v19, %v3673_v24  ;;  %v1772_v8 = vadd.f32 -0.4999988, %v1771_v11  ;;  %v74_v24 = vld [vmem:[#allocation5 + $0x50] sm:$0xff]  ;;  %v55_v11 = vld [vmem:[#allocation2 + $0x58] sm:$0xff] }
 0x133   :  { %v1780_v1 = vmul.f32 %v1779_v21, %v3799_v54  ;;  %vm1897_vm3 = vcmp.lt.s32.totalorder %v3872_v23, 0  ;;  %v1898_v43 = vsub.s32 0, %v3872_v23  ;;  %v3884_v13 = vsel %vm701_vm8, nan, %v710_v12  ;;  %v54_v14 = vld [vmem:[#allocation2 + $0x50] sm:$0xff]  ;;  %v56_v12 = vld [vmem:[#allocation2 + $0x60] sm:$0xff] }
 0x134   :  { %v3888_v28 = vsel %vm547_vm12, nan, %v1175_v50  ;;  %v1330_v18 = vsel %vm1323_vm9, %v1326_v36, %v1329_v45  ;;  %2470 = vrcp.f32 %v3870_v41  ;;  %vm1475_vm13 = vweird.f32 %v2892_v63  ;;  %v77_v36 = vld [vmem:[#allocation5 + $0x68] sm:$0xff] }
 0x135   :  { %v1484_v0 = vsel %vm1477_vm2, %v1480_v25, %v1483_v2  ;;  %v1636_v17 = vxor.u32 2147483648, %v1620_v29  ;;  %v1899_v60 = vsel %vm1897_vm3, %v1898_v43, %v3872_v23  ;;  %v1633_v4 = vxor.u32 2147483648, %v1628_v47  ;;  %v57_v43 = vld [vmem:[#allocation2 + $0x68] sm:$0xff] }
 0x136   :  { %vm1635_vm11 = vcmp.eq.s32.totalorder %v1630_v5, 2  ;;  %v1767_v39 = vsel %vm3768_vm15, 0, %v1765_v56  ;;  %v1900_v34 = vclz %v1899_v60  ;;  %vm1632_vm12 = vcmp.eq.s32.totalorder %v1630_v5, 0  ;;  %v58_v60 = vld [vmem:[#allocation2 + $0x70] sm:$0xff] }
 0x137   :  { %v1773_v33 = vmul.f32 %v1772_v8, %v3799_v54  ;;  %v1781_v27 = vadd.f32 1.0, %v1780_v1  ;;  %v3899_v57 = vmul.f32 %v73_v53, %v73_v53  ;;  %v3903_v63 = vsel %vm701_vm8, nan, %v1330_v18  ;;  %v78_v53 = vld [vmem:[#allocation5 + $0x70] sm:$0xff] }
 0x138   :  { %v3905_v40 = vsel %vm1475_vm13, nan, %v1484_v0  ;;  %v2452_v3 = vadd.s32 4294967294, %v1900_v34  ;;  %v3907_v9 = vmul.f32 %v74_v24, %v74_v24  ;;  %vm1629_vm1 = vweird.f32 %v3187_v49 }
 0x139   :  { %4571 = vst [vmem:[#allocation21_spill] sm:$0xff] %v3899_v57  ;;  %vm1631_vm15 = vcmp.lt.s32.totalorder %v1630_v5, 2  ;;  %v1637_v37 = vsel %vm1635_vm11, %v1636_v17, %v1628_v47  ;;  %v3910_v50 = vand.u32 3, %v1767_v39  ;;  %v1634_v54 = vsel %vm1632_vm12, %v1620_v29, %v1633_v4  ;;  %v79_v4 = vld [vmem:[#allocation5 + $0x78] sm:$0xff] }
 0x13a   :  { %4572 = vst [vmem:[#allocation24_spill] sm:$0xff] %v3907_v9  ;;  %v3912_v30 = vpop.eup %2470  ;;  %v1888_v42 = vadd.s32 %v3794_v35, %v3812_v10  ;;  %vm2453_vm14 = vcmp.lt.s32.totalorder %v2452_v3, 0  ;;  %v3916_v44 = vmul.f32 %v75_v15, %v75_v15  ;;  %v1774_v7 = vadd.f32 1.0, %v1773_v33 }
 0x13b   :  { %v1782_v48 = vmul.f32 %v1781_v27, %v3792_v16  ;;  %v1903_v55 = vsel %vm2453_vm14, 0, %v2452_v3  ;;  %2472 = vrcp.f32 %v3899_v57  ;;  %v1638_v59 = vsel %vm1631_vm15, %v1634_v54, %v1637_v37 }
 0x13c   :  { %4573 = vst [vmem:[#allocation25_spill] sm:$0xff] %v3916_v44  ;;  %v1904_v61 = vsub.s32 32, %v1903_v55  ;;  %v1905_v6 = vshll.u32 %v3872_v23, %v1903_v55  ;;  %v1908_v46 = vsub.s32 4294967266, %v1903_v55  ;;  %2474 = vrcp.f32 %v3907_v9 }
 0x13d   :  { %v4574_v35 = vand.u32 2147483647, %v3293_v62  ;;  %vm1796_vm5 = vcmp.lt.s32.totalorder %v3293_v62, 0  ;;  %v1965_v16 = vmul.f32 %v3912_v30, %v3870_v41  ;;  %vm1785_vm8 = vcmp.lt.s32.totalorder %v3910_v50, 2 }
 0x13e   :  { %v1906_v20 = vshrl.u32 %v1888_v42, %v1904_v61  ;;  %v1909_v19 = vadd.s32 127, %v1908_v46  ;;  %2476 = vrcp.f32 %v3916_v44  ;;  %vm1783_vm9 = vweird.f32 %v4563_v51 }
 0x13f   :  { %vm3925_vm10 = vcmp.le.f32.partialorder %v4574_v35, 0.7853982  ;;  %vm1786_vm0 = vcmp.eq.s32.totalorder %v3910_v50, 0  ;;  %vm1789_vm4 = vcmp.eq.s32.totalorder %v3910_v50, 2  ;;  %v1918_v21 = vsub.s32 4, %v3857_v31 }
 0x140   :  { %v3938_v38 = vmul.f32 %v76_v26, %v76_v26  ;;  %v1787_v45 = vxor.u32 2147483648, %v1782_v48  ;;  %v1790_v2 = vxor.u32 2147483648, %v1774_v7  ;;  %v1907_v29 = vor.u32 %v1906_v20, %v1905_v6  ;;  %v59_v26 = vld [vmem:[#allocation2 + $0x78] sm:$0xff] }
 0x141   :  { %v1910_v23 = vshll.u32 %v1909_v19, 23  ;;  %v3940_v25 = vpop.eup %2472  ;;  %v3944_v47 = vsel %vm1629_vm1, nan, %v1638_v59  ;;  %v3946_v5 = vmul.f32 %v52_v58, %v52_v58  ;;  %v3948_v56 = vmul.f32 %v53_v32, %v53_v32 }
 0x142   :  { %4577 = vst [vmem:[#allocation26_spill] sm:$0xff] %v3938_v38  ;;  %v1966_v8 = vsub.f32 1.0, %v1965_v16  ;;  %v3950_v1 = vpop.eup %2474  ;;  %v1914_v24 = vcvt.s32.f32 %v1907_v29  ;;  %v3952_v0 = vmul.f32 %v54_v14, %v54_v14  ;;  %v3954_v17 = vmul.f32 %v55_v11, %v55_v11 }
 0x143   :  { %4578 = vst [vmem:[#allocation27_spill] sm:$0xff] %v3946_v5  ;;  %v1911_v18 = vor.u32 4788187, %v1910_v23  ;;  %v1919_v49 = vsel %vm1796_vm5, %v1918_v21, %v3857_v31  ;;  %v3959_v39 = vmul.f32 %v77_v36, %v77_v36  ;;  %v3961_v34 = vmul.f32 %v56_v12, %v56_v12 }
 0x144   :  { %4579 = vst [vmem:[#allocation28_spill] sm:$0xff] %v3948_v56  ;;  %2478 = vrcp.f32 %v3938_v38  ;;  %v3964_v15 = vpop.eup %2476  ;;  %v1788_v33 = vsel %vm1786_vm0, %v1774_v7, %v1787_v45  ;;  %v1791_v27 = vsel %vm1789_vm4, %v1790_v2, %v1782_v48  ;;  %v1980_v37 = vmul.f32 %v3940_v25, %v3899_v57 }
 0x145   :  { %4580 = vst [vmem:[#allocation29_spill] sm:$0xff] %v3952_v0  ;;  %v1912_v3 = vand.u32 2147483647, %v1911_v18  ;;  %v3972_v54 = vmul.f32 %v78_v53, %v78_v53  ;;  %v3974_v31 = vmul.f32 %v57_v43, %v57_v43  ;;  %v1967_v42 = vmul.f32 %v3912_v30, %v1966_v8 }
 0x146   :  { %4581 = vst [vmem:[#allocation30_spill] sm:$0xff] %v3954_v17  ;;  %v1995_v55 = vmul.f32 %v3950_v1, %v3907_v9  ;;  %v1921_v7 = vsel %vm3925_vm10, 0, %v1919_v49  ;;  %v3981_v6 = vmul.f32 %v79_v4, %v79_v4  ;;  %v3983_v48 = vmul.f32 %v58_v60, %v58_v60 }
 0x147   :  { %4582 = vst [vmem:[#allocation31_spill] sm:$0xff] %v3961_v34  ;;  %v1915_v61 = vmul.f32 %v1914_v24, %v1912_v3  ;;  %v1792_v46 = vsel %vm1785_vm8, %v1788_v33, %v1791_v27  ;;  %vm1969_vm7 = vweird.f32 %v3870_v41  ;;  %vm1970_vm6 = vweird.f32 %v3912_v30 }
 0x148   :  { %4583 = vst [vmem:[#allocation32_spill] sm:$0xff] %v3974_v31  ;;  %v2010_v59 = vmul.f32 %v3964_v15, %v3916_v44  ;;  %v1973_v16 = vand.u32 2147483647, %v3870_v41  ;;  %v1981_v58 = vsub.f32 1.0, %v1980_v37  ;;  %2480 = vrcp.f32 %v3959_v39  ;;  %vm4005_vm2 = vmor %vm1969_vm7, %vm1970_vm6 }
 0x149   :  { %4584 = vst [vmem:[#allocation33_spill] sm:$0xff] %v3983_v48  ;;  %v1916_v35 = vxor.u32 2147483648, %v1915_v61  ;;  %v3995_v20 = vmul.f32 %v59_v26, %v59_v26  ;;  %v1968_v50 = vadd.f32 %v3912_v30, %v1967_v42  ;;  %v1996_v19 = vsub.f32 1.0, %v1995_v55 }
 0x14a   :  { %v3993_v32 = vpop.eup %2478  ;;  %2482 = vrcp.f32 %v3972_v54  ;;  %v4001_v14 = vsel %vm1783_vm9, nan, %v1792_v46  ;;  %v1975_v12 = vand.u32 2147483648, %v3870_v41  ;;  %v4016_v45 = vand.u32 3, %v1921_v7 }
 0x14b   :  { %4585 = vst [vmem:[#allocation34_spill] sm:$0xff] %v3995_v20  ;;  %v1917_v11 = vsel %vm1796_vm5, %v1916_v35, %v1915_v61  ;;  %2484 = vrcp.f32 %v3981_v6  ;;  %vm1984_vm3 = vweird.f32 %v3899_v57  ;;  %v2011_v51 = vsub.f32 1.0, %v2010_v59 }
 0x14c   :  { %v4014_v36 = vsel %vm3925_vm10, %v3293_v62, %v1917_v11  ;;  %vm4021_vm13 = vcmp.eq.f32.partialorder %v1973_v16, 8.507059e+37  ;;  %v1982_v23 = vmul.f32 %v3940_v25, %v1981_v58  ;;  %v2025_v8 = vmul.f32 %v3993_v32, %v3938_v38 }
 0x14d   :  { %v1922_v2 = vmul.f32 %v4014_v36, %v4014_v36  ;;  %v1972_v10 = vsel %vm4005_vm2, %v3912_v30, %v1968_v50  ;;  %vm1985_vm11 = vweird.f32 %v3940_v25  ;;  %v1988_v43 = vand.u32 2147483647, %v3899_v57 }
 0x14e   :  { %v1997_v53 = vmul.f32 %v3950_v1, %v1996_v19  ;;  %v4034_v18 = vpop.eup %2480  ;;  %v1976_v4 = vor.u32 1.1754944e-38, %v1975_v12  ;;  %v1990_v49 = vand.u32 2147483648, %v3899_v57  ;;  %vm1999_vm12 = vweird.f32 %v3907_v9  ;;  %vm4050_vm15 = vmor %vm1984_vm3, %vm1985_vm11  ;;  %v4612_v19 = vld [vmem:[#allocation19_spill] sm:$0xff] }
 0x14f   :  { %v1923_v24 = vmul.f32 -0.001358992, %v1922_v2  ;;  %v1930_v60 = vmul.f32 -0.00019511016, %v1922_v2  ;;  %vm2000_vm1 = vweird.f32 %v3950_v1  ;;  %v2003_v30 = vand.u32 2147483647, %v3907_v9 }
 0x150   :  { %v4037_v33 = vpop.eup %2482  ;;  %v2012_v27 = vmul.f32 %v3964_v15, %v2011_v51  ;;  %v1983_v55 = vadd.f32 %v3940_v25, %v1982_v23  ;;  %v2026_v26 = vsub.f32 1.0, %v2025_v8  ;;  %v1998_v7 = vadd.f32 %v3950_v1, %v1997_v53  ;;  %vm4066_vm5 = vmor %vm1999_vm12, %vm2000_vm1  ;;  %v4603_v8 = vld [vmem:[#allocation20_spill] sm:$0xff] }
 0x151   :  { %v4043_v3 = vpop.eup %2484  ;;  %v1924_v37 = vadd.f32 0.041655596, %v1923_v24  ;;  %v1931_v42 = vadd.f32 0.008332121, %v1930_v60  ;;  %v2005_v46 = vand.u32 2147483648, %v3907_v9  ;;  %vm2014_vm14 = vweird.f32 %v3916_v44  ;;  %v4605_v24 = vld [vmem:[#allocation13_spill] sm:$0xff] }
 0x152   :  { %vm2015_vm10 = vweird.f32 %v3964_v15  ;;  %v4060_v16 = vsel %vm4021_vm13, %v1976_v4, %v1972_v10  ;;  %v2020_v50 = vand.u32 2147483648, %v3916_v44  ;;  %vm4071_vm8 = vcmp.eq.f32.partialorder %v1988_v43, 8.507059e+37 }
 0x153   :  { %v1925_v59 = vmul.f32 %v1924_v37, %v1922_v2  ;;  %v1932_v35 = vmul.f32 %v1931_v42, %v1922_v2  ;;  %v2013_v11 = vadd.f32 %v3964_v15, %v2012_v27  ;;  %v2018_v21 = vand.u32 2147483647, %v3916_v44  ;;  %vm4082_vm9 = vmor %vm2014_vm14, %vm2015_vm10 }
 0x154   :  { %v2040_v12 = vmul.f32 %v4034_v18, %v3959_v39  ;;  %v1987_v29 = vsel %vm4050_vm15, %v3940_v25, %v1983_v55  ;;  %v1991_v23 = vor.u32 1.1754944e-38, %v1990_v49  ;;  %v2027_v10 = vmul.f32 %v3993_v32, %v2026_v26 }
 0x155   :  { %v1933_v51 = vadd.f32 -0.16666654, %v1932_v35  ;;  %v1926_v43 = vadd.f32 -0.4999988, %v1925_v59  ;;  %v2002_v53 = vsel %vm4066_vm5, %v3950_v1, %v1998_v7  ;;  %vm4090_vm0 = vcmp.eq.f32.partialorder %v2003_v30, 8.507059e+37 }
 0x156   :  { %v2006_v60 = vor.u32 1.1754944e-38, %v2005_v46  ;;  %v2021_v27 = vor.u32 1.1754944e-38, %v2020_v50  ;;  %vm2029_vm4 = vweird.f32 %v3938_v38  ;;  %vm2030_vm7 = vweird.f32 %v3993_v32 }
 0x157   :  { %v1934_v4 = vmul.f32 %v1933_v51, %v1922_v2  ;;  %v2017_v25 = vsel %vm4082_vm9, %v3964_v15, %v2013_v11  ;;  %vm2019_vm6 = vcmp.eq.f32.partialorder %v2018_v21, 8.507059e+37  ;;  %v2035_v49 = vand.u32 2147483648, %v3938_v38  ;;  %vm4116_vm2 = vmor %vm2029_vm4, %vm2030_vm7 }
 0x158   :  { %v2041_v37 = vsub.f32 1.0, %v2040_v12  ;;  %v4101_v1 = vadd.f32 %v3993_v32, %v2027_v10  ;;  %v2050_v30 = vand.u32 2147483648, %v3959_v39  ;;  %v2055_v42 = vmul.f32 %v4037_v33, %v3972_v54 }
 0x159   :  { %v2070_v55 = vmul.f32 %v4043_v3, %v3981_v6  ;;  %v1927_v26 = vmul.f32 %v1926_v43, %v1922_v2  ;;  %v1935_v61 = vadd.f32 1.0, %v1934_v4  ;;  %v4110_v15 = vsel %vm4071_vm8, %v1991_v23, %v1987_v29  ;;  %v4602_v23 = vld [vmem:[#allocation11_spill] sm:$0xff]  ;;  %v4604_v43 = vld [vmem:[#allocation12_spill] sm:$0xff] }
 0x15a   :  { %v4114_v7 = vsel %vm4090_vm0, %v2006_v60, %v2002_v53  ;;  %v4120_v59 = vsel %vm2019_vm6, %v2021_v27, %v2017_v25  ;;  %v2033_v35 = vand.u32 2147483647, %v3938_v38  ;;  %vm2044_vm3 = vweird.f32 %v3959_v39  ;;  %v4606_v60 = vld [vmem:[#allocation22_spill] sm:$0xff]  ;;  %v4607_v27 = vld [vmem:[#allocation15_spill] sm:$0xff] }
 0x15b   :  { %vm2045_vm13 = vweird.f32 %v4034_v18  ;;  %vm1940_vm11 = vcmp.eq.s32.totalorder %v4016_v45, 0  ;;  %vm1943_vm12 = vcmp.eq.s32.totalorder %v4016_v45, 2  ;;  %v4127_v2 = vor.u32 1.1754944e-38, %v2035_v49  ;;  %v4608_v25 = vld [vmem:[#allocation23_spill] sm:$0xff] }
 0x15c   :  { %v2042_v58 = vmul.f32 %v4034_v18, %v2041_v37  ;;  %v2048_v50 = vand.u32 2147483647, %v3959_v39  ;;  %vm2059_vm1 = vweird.f32 %v3972_v54  ;;  %v4136_v11 = vor.u32 1.1754944e-38, %v2050_v30  ;;  %v4609_v37 = vld [vmem:[#allocation16_spill] sm:$0xff]  ;;  %vm4195_vm4 = vmor %vm2044_vm3, %vm2045_vm13 }
 0x15d   :  { %v2056_v21 = vsub.f32 1.0, %v2055_v42  ;;  %v2071_v12 = vsub.f32 1.0, %v2070_v55  ;;  %v1928_v51 = vadd.f32 1.0, %v1927_v26  ;;  %v1936_v29 = vmul.f32 %v1935_v61, %v4014_v36  ;;  %v4610_v42 = vld [vmem:[#allocation17_spill] sm:$0xff]  ;;  %v4611_v26 = vld [vmem:[#allocation14_spill] sm:$0xff] }
 0x15e   :  { %v2084_v10 = vmul.f32 %v4603_v8, %v4602_v23  ;;  %v2085_v53 = vmul.f32 %v3636_v22, %v4604_v43  ;;  %v2086_v4 = vmul.f32 %v4606_v60, %v4605_v24  ;;  %v2088_v49 = vmul.f32 %v4608_v25, %v4607_v27 }
 0x15f   :  { %v2089_v30 = vmul.f32 %v3830_v52, %v4609_v37  ;;  %v2090_v55 = vmul.f32 %v3888_v28, %v4610_v42  ;;  %vm1939_vm15 = vcmp.lt.s32.totalorder %v4016_v45, 2  ;;  %v4153_v36 = vadd.f32 %v4034_v18, %v2042_v58 }
 0x160   :  { %vm2060_vm14 = vweird.f32 %v4037_v33  ;;  %v2087_v61 = vmul.f32 %v3884_v13, %v4611_v26  ;;  %v2091_v44 = vmul.f32 %v3903_v63, %v4612_v19  ;;  %v2057_v9 = vmul.f32 %v4037_v33, %v2056_v21 }
 0x161   :  { %v2063_v57 = vand.u32 2147483647, %v3972_v54  ;;  %v2065_v38 = vand.u32 2147483648, %v3972_v54  ;;  %vm2074_vm10 = vweird.f32 %v3981_v6  ;;  %v1941_v41 = vxor.u32 2147483648, %v1936_v29  ;;  %vm4211_vm7 = vmor %vm2059_vm1, %vm2060_vm14 }
 0x162   :  { %v1944_v17 = vxor.u32 2147483648, %v1928_v51  ;;  %vm4164_vm5 = vcmp.eq.f32.partialorder %v2033_v35, 8.507059e+37  ;;  %v2072_v0 = vmul.f32 %v4043_v3, %v2071_v12  ;;  %vm2075_vm8 = vweird.f32 %v4043_v3 }
 0x163   :  { %vm1937_vm9 = vweird.f32 %v3293_v62  ;;  %vm4171_vm0 = vcmp.eq.f32.partialorder %v2048_v50, 8.507059e+37  ;;  %v2092_v56 = vadd.f32 %v2088_v49, %v2084_v10  ;;  %v2093_v5 = vadd.f32 %v2089_v30, %v2085_v53  ;;  %vm4219_vm6 = vmor %vm2074_vm10, %vm2075_vm8 }
 0x164   :  { %v2094_v20 = vadd.f32 %v2090_v55, %v2086_v4  ;;  %v2096_v48 = vmul.f32 %v4603_v8, %v4607_v27  ;;  %v2095_v35 = vadd.f32 %v2091_v44, %v2087_v61  ;;  %v2097_v31 = vmul.f32 %v3636_v22, %v4609_v37  ;;  %v4633_v8 = vld [vmem:[#allocation28_spill] sm:$0xff] }
 0x165   :  { %v2100_v12 = vmul.f32 %v4608_v25, %v4602_v23  ;;  %v2101_v34 = vmul.f32 %v3830_v52, %v4604_v43  ;;  %v2098_v50 = vmul.f32 %v4606_v60, %v4610_v42  ;;  %v2099_v10 = vmul.f32 %v3884_v13, %v4612_v19 }
 0x166   :  { %v2102_v53 = vmul.f32 %v3888_v28, %v4605_v24  ;;  %v2103_v44 = vmul.f32 %v3903_v63, %v4611_v26  ;;  %v2058_v52 = vadd.f32 %v4037_v33, %v2057_v9  ;;  %v2073_v23 = vadd.f32 %v4043_v3, %v2072_v0 }
 0x167   :  { %v2078_v13 = vand.u32 2147483647, %v3981_v6  ;;  %v2080_v19 = vand.u32 2147483648, %v3981_v6  ;;  %v1942_v28 = vsel %vm1940_vm11, %v1928_v51, %v1941_v41  ;;  %v1945_v63 = vsel %vm1943_vm12, %v1944_v17, %v1936_v29 }
 0x168   :  { %v2108_v9 = vmul.f32 %v2092_v56, %v2092_v56  ;;  %v2109_v0 = vmul.f32 %v2093_v5, %v2093_v5  ;;  %v2104_v41 = vsub.f32 %v2096_v48, %v2100_v12  ;;  %v2105_v17 = vsub.f32 %v2097_v31, %v2101_v34 }
 0x169   :  { %v2110_v51 = vmul.f32 %v2094_v20, %v2094_v20  ;;  %v2111_v29 = vmul.f32 %v2095_v35, %v2095_v35  ;;  %v2047_v24 = vsel %vm4195_vm4, %v4034_v18, %v4153_v36  ;;  %vm4227_vm3 = vcmp.eq.f32.partialorder %v2063_v57, 8.507059e+37 }
 0x16a   :  { %v2106_v5 = vsub.f32 %v2098_v50, %v2102_v53  ;;  %v2107_v60 = vsub.f32 %v2099_v10, %v2103_v44  ;;  %v2062_v4 = vsel %vm4211_vm7, %v4037_v33, %v2058_v52  ;;  %v2066_v27 = vor.u32 1.1754944e-38, %v2065_v38  ;;  %v4628_v10 = vld [vmem:[#allocation31_spill] sm:$0xff]  ;;  %v4629_v44 = vld [vmem:[#allocation32_spill] sm:$0xff]  ;;  %v4630_v52 = vld [vmem:[#allocation33_spill] sm:$0xff] }
 0x16b   :  { %vm4234_vm13 = vcmp.eq.f32.partialorder %v2078_v13, 8.507059e+37  ;;  %v2081_v31 = vor.u32 1.1754944e-38, %v2080_v19  ;;  %v1946_v48 = vsel %vm1939_vm15, %v1942_v28, %v1945_v63  ;;  %v2077_v57 = vsel %vm4219_vm6, %v4043_v3, %v2073_v23  ;;  %v4631_v13 = vld [vmem:[#allocation34_spill] sm:$0xff]  ;;  %v4632_v28 = vld [vmem:[#allocation27_spill] sm:$0xff] }
 0x16c   :  { %v2112_v20 = vmul.f32 2.0, %v2108_v9  ;;  %v2113_v18 = vmul.f32 2.0, %v2109_v0  ;;  %v2114_v25 = vmul.f32 2.0, %v2110_v51  ;;  %v2115_v49 = vmul.f32 2.0, %v2111_v29  ;;  %v4634_v0 = vld [vmem:[#allocation29_spill] sm:$0xff] }
 0x16d   :  { %v2120_v37 = vmul.f32 %v2104_v41, %v2104_v41  ;;  %v2121_v30 = vmul.f32 %v2105_v17, %v2105_v17  ;;  %v4627_v38 = vsel %vm4116_vm2, %v3993_v32, %v4101_v1  ;;  %v2122_v33 = vmul.f32 %v2106_v5, %v2106_v5  ;;  %v4635_v41 = vld [vmem:[#allocation30_spill] sm:$0xff] }
 0x16e   :  { %v2037_v45 = vsel %vm4164_vm5, %v4127_v2, %v4627_v38  ;;  %v2123_v42 = vmul.f32 %v2107_v60, %v2107_v60  ;;  %v2136_v3 = vmul.f32 %v3905_v40, %v3905_v40  ;;  %v1947_v55 = vsel %vm1937_vm9, nan, %v1946_v48 }
 0x16f   :  { %v2052_v36 = vsel %vm4171_vm0, %v4136_v11, %v2047_v24  ;;  %v2137_v46 = vmul.f32 %v3944_v47, %v3944_v47  ;;  %v2138_v32 = vmul.f32 %v4001_v14, %v4001_v14  ;;  %v4264_v1 = vsel %vm4227_vm3, %v2066_v27, %v2062_v4 }
 0x170   :  { %v4268_v40 = vsel %vm4234_vm13, %v2081_v31, %v2077_v57  ;;  %v4271_v62 = vmul.f32 %v2112_v20, %v4060_v16  ;;  %v4274_v2 = vmul.f32 %v2113_v18, %v4110_v15  ;;  %v4277_v11 = vmul.f32 %v2114_v25, %v4114_v7 }
 0x171   :  { %v4280_v47 = vmul.f32 %v2115_v49, %v4120_v59  ;;  %v2124_v14 = vmul.f32 2.0, %v2120_v37  ;;  %v2125_v26 = vmul.f32 2.0, %v2121_v30  ;;  %v4282_v61 = vmul.f32 2.0, %v2122_v33 }
 0x172   :  { %v4284_v58 = vmul.f32 2.0, %v2123_v42  ;;  %v4286_v21 = vmul.f32 %v1947_v55, %v1947_v55  ;;  %v2140_v35 = vsub.f32 1.0, %v2136_v3  ;;  %v2141_v12 = vsub.f32 1.0, %v2137_v46 }
 0x173   :  { %v2142_v50 = vsub.f32 1.0, %v2138_v32  ;;  %v2144_v53 = vmul.f32 %v4060_v16, %v4628_v10  ;;  %v2145_v22 = vmul.f32 %v4110_v15, %v4629_v44  ;;  %v2146_v23 = vmul.f32 %v4114_v7, %v4630_v52 }
 0x174   :  { %v2147_v19 = vmul.f32 %v4120_v59, %v4631_v13  ;;  %v2148_v63 = vmul.f32 %v2037_v45, %v4632_v28  ;;  %v2149_v9 = vmul.f32 %v2052_v36, %v4633_v8  ;;  %v2150_v43 = vmul.f32 %v4264_v1, %v4634_v0 }
 0x175   :  { %v2151_v17 = vmul.f32 %v4268_v40, %v4635_v41  ;;  %v2160_v51 = vmul.f32 %v2037_v45, %v4628_v10  ;;  %v2161_v29 = vmul.f32 %v2052_v36, %v4629_v44  ;;  %v2164_v24 = vmul.f32 %v4060_v16, %v4632_v28 }
 0x176   :  { %v2165_v56 = vmul.f32 %v4110_v15, %v4633_v8  ;;  %v2188_v5 = vmul.f32 %v4628_v10, %v4632_v28  ;;  %v4312_v60 = vmul.f32 %v4629_v44, %v4633_v8  ;;  %v2143_v4 = vsub.f32 1.0, %v4286_v21  ;;  %v4637_v44 = vld [vmem:[#allocation26_spill] sm:$0xff] }
 0x177   :  { %v2162_v27 = vmul.f32 %v4264_v1, %v4630_v52  ;;  %v2166_v34 = vmul.f32 %v4114_v7, %v4634_v0  ;;  %v4321_v16 = vmul.f32 %v4630_v52, %v4634_v0  ;;  %v2152_v15 = vadd.f32 %v2148_v63, %v2144_v53  ;;  %v4636_v53 = vld [vmem:[#allocation18_spill] sm:$0xff] }
 0x178   :  { %v2153_v31 = vadd.f32 %v2149_v9, %v2145_v22  ;;  %v4325_v48 = vmul.f32 %v4631_v13, %v4635_v41  ;;  %2486 = vrcp.f32 %v2188_v5  ;;  %v2154_v57 = vadd.f32 %v2150_v43, %v2146_v23  ;;  %v4638_v23 = vld [vmem:[#allocation21_spill] sm:$0xff] }
 0x179   :  { %v2155_v20 = vadd.f32 %v2151_v17, %v2147_v19  ;;  %v2163_v18 = vmul.f32 %v4268_v40, %v4631_v13  ;;  %v2167_v25 = vmul.f32 %v4120_v59, %v4635_v41  ;;  %v4331_v7 = vmul.f32 %v2124_v14, %v2037_v45 }
 0x17a   :  { %v2168_v49 = vadd.f32 %v2164_v24, %v2160_v51  ;;  %v2169_v37 = vadd.f32 %v2165_v56, %v2161_v29  ;;  %2488 = vrcp.f32 %v4312_v60  ;;  %v4334_v30 = vmul.f32 %v2125_v26, %v2052_v36 }
 0x17b   :  { %v2170_v38 = vadd.f32 %v2166_v34, %v2162_v27  ;;  %v2201_v33 = vand.u32 2147483647, %v2188_v5  ;;  %2490 = vrcp.f32 %v4321_v16  ;;  %v4337_v42 = vmul.f32 %v2152_v15, %v2140_v35 }
 0x17c   :  { %v4339_v55 = vmul.f32 %v2153_v31, %v2141_v12  ;;  %v2203_v10 = vand.u32 2147483648, %v2188_v5  ;;  %2492 = vrcp.f32 %v4325_v48  ;;  %v4342_v59 = vmul.f32 %v2154_v57, %v2142_v50  ;;  %v4639_v12 = vld [vmem:[#allocation24_spill] sm:$0xff]  ;;  %v4644_v57 = vld [vmem:[#allocation25_spill] sm:$0xff] }
 0x17d   :  { %v4344_v45 = vmul.f32 %v2155_v20, %v2143_v4  ;;  %v2171_v14 = vadd.f32 %v2167_v25, %v2163_v18  ;;  %v2184_v36 = vmul.f32 %v4637_v44, %v4636_v53  ;;  %v2172_v22 = vmul.f32 %v2168_v49, %v2136_v3 }
 0x17e   :  { %v2487_v26 = vpop.eup %2486  ;;  %v4348_v52 = vmul.f32 %v2169_v37, %v2137_v46  ;;  %v2185_v35 = vmul.f32 %v3959_v39, %v4638_v23  ;;  %v2186_v13 = vmul.f32 %v3972_v54, %v4639_v12  ;;  %v4354_v19 = vmul.f32 %v2170_v38, %v2138_v32 }
 0x17f   :  { %v2193_v50 = vmul.f32 %v2487_v26, %v2188_v5  ;;  %vm2197_vm2 = vweird.f32 %v2188_v5  ;;  %vm4356_vm11 = vcmp.eq.f32.partialorder %v2201_v33, 8.507059e+37  ;;  %v2204_v8 = vor.u32 1.1754944e-38, %v2203_v10 }
 0x180   :  { %v2489_v63 = vpop.eup %2488  ;;  %vm2212_vm12 = vweird.f32 %v4312_v60  ;;  %v2216_v3 = vand.u32 2147483647, %v4312_v60  ;;  %v2218_v46 = vand.u32 2147483648, %v4312_v60  ;;  %vm2198_vm1 = vweird.f32 %v2487_v26 }
 0x181   :  { %v2491_v39 = vpop.eup %2490  ;;  %v2194_v9 = vsub.f32 1.0, %v2193_v50  ;;  %v2208_v54 = vmul.f32 %v2489_v63, %v4312_v60  ;;  %vm2227_vm15 = vweird.f32 %v4321_v16  ;;  %v2231_v43 = vand.u32 2147483647, %v4321_v16  ;;  %vm4371_vm5 = vmor %vm2197_vm2, %vm2198_vm1 }
 0x182   :  { %v2493_v32 = vpop.eup %2492  ;;  %v2223_v0 = vmul.f32 %v2491_v39, %v4321_v16  ;;  %v2233_v41 = vand.u32 2147483648, %v4321_v16  ;;  %vm2242_vm14 = vweird.f32 %v4325_v48  ;;  %vm2213_vm10 = vweird.f32 %v2489_v63 }
 0x183   :  { %v2195_v17 = vmul.f32 %v2487_v26, %v2194_v9  ;;  %v2209_v51 = vsub.f32 1.0, %v2208_v54  ;;  %v2238_v29 = vmul.f32 %v2493_v32, %v4325_v48  ;;  %vm2228_vm8 = vweird.f32 %v2491_v39  ;;  %vm4381_vm0 = vmor %vm2212_vm12, %vm2213_vm10 }
 0x184   :  { %v2224_v56 = vsub.f32 1.0, %v2223_v0  ;;  %v2246_v4 = vand.u32 2147483647, %v4325_v48  ;;  %v2248_v27 = vand.u32 2147483648, %v4325_v48  ;;  %vm2243_vm9 = vweird.f32 %v2493_v32  ;;  %vm4393_vm7 = vmor %vm2227_vm15, %vm2228_vm8 }
 0x185   :  { %v2196_v34 = vadd.f32 %v2487_v26, %v2195_v17  ;;  %v2210_v15 = vmul.f32 %v2489_v63, %v2209_v51  ;;  %v2239_v31 = vsub.f32 1.0, %v2238_v29  ;;  %v2187_v20 = vmul.f32 %v3981_v6, %v4644_v57  ;;  %vm4401_vm3 = vmor %vm2242_vm14, %vm2243_vm9 }
 0x186   :  { %vm4385_vm4 = vcmp.eq.f32.partialorder %v2216_v3, 8.507059e+37  ;;  %v2219_v25 = vor.u32 1.1754944e-38, %v2218_v46  ;;  %v2225_v49 = vmul.f32 %v2491_v39, %v2224_v56  ;;  %v2234_v60 = vor.u32 1.1754944e-38, %v2233_v41 }
 0x187   :  { %v2200_v37 = vsel %vm4371_vm5, %v2487_v26, %v2196_v34  ;;  %v2211_v38 = vadd.f32 %v2489_v63, %v2210_v15  ;;  %v2240_v33 = vmul.f32 %v2493_v32, %v2239_v31  ;;  %vm2232_vm6 = vcmp.eq.f32.partialorder %v2231_v43, 8.507059e+37 }
 0x188   :  { %v2205_v10 = vsel %vm4356_vm11, %v2204_v8, %v2200_v37  ;;  %v2226_v53 = vadd.f32 %v2491_v39, %v2225_v49  ;;  %v2249_v26 = vor.u32 1.1754944e-38, %v2248_v27  ;;  %vm2247_vm13 = vcmp.eq.f32.partialorder %v2246_v4, 8.507059e+37 }
 0x189   :  { %v2206_v23 = vmul.f32 %v2205_v10, %v2184_v36  ;;  %v2215_v16 = vsel %vm4381_vm0, %v2489_v63, %v2211_v38  ;;  %v2241_v12 = vadd.f32 %v2493_v32, %v2240_v33  ;;  %v2175_v50 = vmul.f32 %v2171_v14, %v4286_v21 }
 0x18a   :  { %v2176_v28 = vadd.f32 %v2172_v22, %v4337_v42  ;;  %v2220_v8 = vsel %vm4385_vm4, %v2219_v25, %v2215_v16  ;;  %v2230_v48 = vsel %vm4393_vm7, %v2491_v39, %v2226_v53  ;;  %v2130_v63 = vmul.f32 %v4282_v61, %v4264_v1 }
 0x18b   :  { %v2221_v3 = vmul.f32 %v2220_v8, %v2185_v35  ;;  %v2235_v46 = vsel %vm2232_vm6, %v2234_v60, %v2230_v48  ;;  %v2245_v36 = vsel %vm4401_vm3, %v2493_v32, %v2241_v12  ;;  %2494 = vlog2.f32 %v2206_v23 }
 0x18c   :  { %v2177_v21 = vadd.f32 %v4348_v52, %v4339_v55  ;;  %v2236_v14 = vmul.f32 %v2235_v46, %v2186_v13  ;;  %v2250_v42 = vsel %vm2247_vm13, %v2249_v26, %v2245_v36  ;;  %v2131_v22 = vmul.f32 %v4284_v58, %v4268_v40 }
 0x18d   :  { %v2178_v39 = vadd.f32 %v4354_v19, %v4342_v59  ;;  %v2251_v35 = vmul.f32 %v2250_v42, %v2187_v20  ;;  %2496 = vlog2.f32 %v2221_v3  ;;  %v2132_v9 = vadd.f32 %v4331_v7, %v4271_v62 }
 0x18e   :  { %v2179_v54 = vadd.f32 %v2175_v50, %v4344_v45  ;;  %v2180_v32 = vmul.f32 0.5, %v2176_v28  ;;  %2498 = vlog2.f32 %v2236_v14  ;;  %v2133_v1 = vadd.f32 %v4334_v30, %v4274_v2 }
 0x18f   :  { %2500 = vlog2.f32 %v2251_v35  ;;  %v2181_v61 = vmul.f32 0.5, %v2177_v21  ;;  %v2134_v40 = vadd.f32 %v2130_v63, %v4277_v11  ;;  %v2182_v58 = vmul.f32 0.5, %v2178_v39 }
 0x190   :  { %v2135_v59 = vadd.f32 %v2131_v22, %v4280_v47  ;;  %v2183_v52 = vmul.f32 0.5, %v2179_v54  ;;  %v2264_v19 = vadd.f32 %v2180_v32, %v2132_v9 }
 0x191   :  { %v2495_v55 = vpop.eup %2494  ;;  %v2265_v43 = vadd.f32 %v2181_v61, %v2133_v1  ;;  %v2266_v51 = vadd.f32 %v2182_v58, %v2134_v40 }
 0x192   :  { %v2253_v13 = vmul.f32 0.6931472, %v2495_v55  ;;  %v2267_v30 = vadd.f32 %v2183_v52, %v2135_v59 }
 0x193   :  { %v2497_v0 = vpop.eup %2496 }
 0x194   :  { %v2499_v62 = vpop.eup %2498  ;;  %v2255_v7 = vmul.f32 0.6931472, %v2497_v0  ;;  %v2260_v45 = vmul.f32 0.5, %v2253_v13 }
 0x195   :  { %v2501_v41 = vpop.eup %2500  ;;  %v2257_v17 = vmul.f32 0.6931472, %v2499_v62 }
 0x196   :  { %v2259_v29 = vmul.f32 0.6931472, %v2501_v41  ;;  %v2261_v2 = vmul.f32 0.5, %v2255_v7  ;;  %v2268_v24 = vadd.f32 %v2264_v19, %v2260_v45 }
 0x197   :  { %v2262_v56 = vmul.f32 0.5, %v2257_v17 }
 0x198   :  { %v2263_v11 = vmul.f32 0.5, %v2259_v29  ;;  %v2269_v4 = vadd.f32 %v2265_v43, %v2261_v2  ;;  %v2454_v27 = vadd.f32 -1.0, %v2268_v24 }
 0x199   :  { %v2270_v47 = vadd.f32 %v2266_v51, %v2262_v56 }
 0x19a   :  { %v2271_v34 = vadd.f32 %v2267_v30, %v2263_v11  ;;  %v2455_v15 = vadd.f32 -1.0, %v2269_v4  ;;  %v2276_v31 = vmax.f32 %v2454_v27, 1e-07 }
 0x19b   :  { %v2456_v57 = vadd.f32 -1.0, %v2270_v47 }
 0x19c   :  { %v2457_v20 = vadd.f32 -1.0, %v2271_v34  ;;  %v2277_v5 = vmax.f32 %v2455_v15, 1e-07  ;;  %2502 = vrsqrt.f32 %v2276_v31  ;;  %vm2287_vm2 = vcmp.eq.f32.partialorder %v2276_v31, inf }
 0x19d   :  { %v2278_v18 = vmax.f32 %v2456_v57, 1e-07  ;;  %vm2289_vm11 = vcmp.eq.f32.partialorder %v2276_v31, 0.0  ;;  %v2290_v36 = vand.u32 2147483648, %v2276_v31 }
 0x19e   :  { %v2279_v25 = vmax.f32 %v2457_v20, 1e-07  ;;  %2504 = vrsqrt.f32 %v2277_v5  ;;  %vm2299_vm12 = vcmp.eq.f32.partialorder %v2277_v5, inf  ;;  %vm2301_vm1 = vcmp.eq.f32.partialorder %v2277_v5, 0.0 }
 0x19f   :  { %2506 = vrsqrt.f32 %v2278_v18  ;;  %v2302_v22 = vand.u32 2147483648, %v2277_v5  ;;  %vm2311_vm15 = vcmp.eq.f32.partialorder %v2278_v18, inf  ;;  %vm2313_vm14 = vcmp.eq.f32.partialorder %v2278_v18, 0.0 }
 0x1a0   :  { %2508 = vrsqrt.f32 %v2279_v25  ;;  %v2314_v54 = vand.u32 2147483648, %v2278_v18  ;;  %vm2323_vm10 = vcmp.eq.f32.partialorder %v2279_v25, inf  ;;  %v2326_v55 = vand.u32 2147483648, %v2279_v25 }
 0x1a1   :  { %vm2325_vm5 = vcmp.eq.f32.partialorder %v2279_v25, 0.0 }
 0x1a2   :  { %v2503_v49 = vpop.eup %2502 }
 0x1a3   :  { %v2281_v37 = vmul.f32 %v2503_v49, %v2276_v31 }
 0x1a4   :  { %v2505_v38 = vpop.eup %2504 }
 0x1a5   :  { %v2507_v6 = vpop.eup %2506  ;;  %v2282_v60 = vmul.f32 %v2503_v49, %v2281_v37  ;;  %v2293_v33 = vmul.f32 %v2505_v38, %v2277_v5 }
 0x1a6   :  { %v2509_v10 = vpop.eup %2508  ;;  %v2305_v53 = vmul.f32 %v2507_v6, %v2278_v18 }
 0x1a7   :  { %v2283_v44 = vmul.f32 0.5, %v2282_v60  ;;  %v2294_v26 = vmul.f32 %v2505_v38, %v2293_v33  ;;  %v2317_v23 = vmul.f32 %v2509_v10, %v2279_v25 }
 0x1a8   :  { %v2306_v16 = vmul.f32 %v2507_v6, %v2305_v53 }
 0x1a9   :  { %v2284_v12 = vsub.f32 1.5, %v2283_v44  ;;  %v2295_v50 = vmul.f32 0.5, %v2294_v26  ;;  %v2318_v28 = vmul.f32 %v2509_v10, %v2317_v23 }
 0x1aa   :  { %v2307_v8 = vmul.f32 0.5, %v2306_v16 }
 0x1ab   :  { %v2285_v48 = vmul.f32 %v2503_v49, %v2284_v12  ;;  %v2296_v3 = vsub.f32 1.5, %v2295_v50  ;;  %v2319_v46 = vmul.f32 0.5, %v2318_v28 }
 0x1ac   :  { %v2308_v63 = vsub.f32 1.5, %v2307_v8 }
 0x1ad   :  { %v2286_v21 = vmul.f32 %v2285_v48, %v2276_v31  ;;  %v2297_v14 = vmul.f32 %v2505_v38, %v2296_v3  ;;  %v2320_v42 = vsub.f32 1.5, %v2319_v46 }
 0x1ae   :  { %v2309_v39 = vmul.f32 %v2507_v6, %v2308_v63 }
 0x1af   :  { %v2288_v35 = vsel %vm2287_vm2, %v2276_v31, %v2286_v21  ;;  %v2298_v9 = vmul.f32 %v2297_v14, %v2277_v5  ;;  %v2321_v32 = vmul.f32 %v2509_v10, %v2320_v42 }
 0x1b0   :  { %v2291_v1 = vsel %vm2289_vm11, %v2290_v36, %v2288_v35  ;;  %v2310_v61 = vmul.f32 %v2309_v39, %v2278_v18 }
 0x1b1   :  { %v2300_v40 = vsel %vm2299_vm12, %v2277_v5, %v2298_v9  ;;  %v2322_v58 = vmul.f32 %v2321_v32, %v2279_v25  ;;  %v2328_v59 = vadd.f32 1.0, %v2291_v1 }
 0x1b2   :  { %v2303_v52 = vsel %vm2301_vm1, %v2302_v22, %v2300_v40  ;;  %v2312_v13 = vsel %vm2311_vm15, %v2278_v18, %v2310_v61 }
 0x1b3   :  { %v2315_v19 = vsel %vm2313_vm14, %v2314_v54, %v2312_v13  ;;  %v2324_v0 = vsel %vm2323_vm10, %v2279_v25, %v2322_v58  ;;  %v2329_v62 = vadd.f32 1.0, %v2303_v52  ;;  %2510 = vrcp.f32 %v2328_v59 }
 0x1b4   :  { %v2327_v7 = vsel %vm2325_vm5, %v2326_v55, %v2324_v0  ;;  %v2330_v45 = vadd.f32 1.0, %v2315_v19  ;;  %v2341_v41 = vand.u32 2147483647, %v2328_v59  ;;  %v2343_v51 = vand.u32 2147483648, %v2328_v59 }
 0x1b5   :  { %v2331_v43 = vadd.f32 1.0, %v2327_v7  ;;  %2512 = vrcp.f32 %v2329_v62  ;;  %vm2337_vm8 = vweird.f32 %v2328_v59  ;;  %vm2352_vm0 = vweird.f32 %v2329_v62 }
 0x1b6   :  { %2514 = vrcp.f32 %v2330_v45  ;;  %vm4433_vm9 = vcmp.eq.f32.partialorder %v2341_v41, 8.507059e+37  ;;  %v2358_v24 = vand.u32 2147483648, %v2329_v62  ;;  %v2356_v27 = vand.u32 2147483647, %v2329_v62 }
 0x1b7   :  { %2516 = vrcp.f32 %v2331_v43  ;;  %v2344_v47 = vor.u32 1.1754944e-38, %v2343_v51  ;;  %vm2367_vm7 = vweird.f32 %v2330_v45  ;;  %v2371_v15 = vand.u32 2147483647, %v2330_v45 }
 0x1b8   :  { %v2373_v5 = vand.u32 2147483648, %v2330_v45  ;;  %v2359_v25 = vor.u32 1.1754944e-38, %v2358_v24  ;;  %vm2382_vm2 = vweird.f32 %v2331_v43  ;;  %v2388_v60 = vand.u32 2147483648, %v2331_v43 }
 0x1b9   :  { %v2511_v17 = vpop.eup %2510  ;;  %v2386_v44 = vand.u32 2147483647, %v2331_v43  ;;  %vm2357_vm1 = vcmp.eq.f32.partialorder %v2356_v27, 8.507059e+37  ;;  %vm2372_vm14 = vcmp.eq.f32.partialorder %v2371_v15, 8.507059e+37 }
 0x1ba   :  { %v2333_v29 = vmul.f32 %v2511_v17, %v2328_v59  ;;  %vm2338_vm4 = vweird.f32 %v2511_v17  ;;  %v2374_v16 = vor.u32 1.1754944e-38, %v2373_v5  ;;  %v2389_v3 = vor.u32 1.1754944e-38, %v2388_v60 }
 0x1bb   :  { %v2513_v2 = vpop.eup %2512  ;;  %vm4438_vm3 = vmor %vm2337_vm8, %vm2338_vm4  ;;  %vm2387_vm5 = vcmp.eq.f32.partialorder %v2386_v44, 8.507059e+37 }
 0x1bc   :  { %v2515_v56 = vpop.eup %2514  ;;  %v2334_v11 = vsub.f32 1.0, %v2333_v29  ;;  %v2348_v4 = vmul.f32 %v2513_v2, %v2329_v62  ;;  %vm2353_vm6 = vweird.f32 %v2513_v2 }
 0x1bd   :  { %v2363_v34 = vmul.f32 %v2515_v56, %v2330_v45  ;;  %v2517_v31 = vpop.eup %2516  ;;  %vm2368_vm13 = vweird.f32 %v2515_v56  ;;  %vm4443_vm11 = vmor %vm2352_vm0, %vm2353_vm6 }
 0x1be   :  { %v2335_v57 = vmul.f32 %v2511_v17, %v2334_v11  ;;  %v2349_v20 = vsub.f32 1.0, %v2348_v4  ;;  %v2378_v37 = vmul.f32 %v2517_v31, %v2331_v43  ;;  %vm2383_vm12 = vweird.f32 %v2517_v31  ;;  %vm2369_vm15 = vmor %vm2367_vm7, %vm2368_vm13 }
 0x1bf   :  { %v2364_v49 = vsub.f32 1.0, %v2363_v34  ;;  %vm4455_vm10 = vmor %vm2382_vm2, %vm2383_vm12 }
 0x1c0   :  { %v2336_v38 = vadd.f32 %v2511_v17, %v2335_v57  ;;  %v2350_v6 = vmul.f32 %v2513_v2, %v2349_v20  ;;  %v2379_v53 = vsub.f32 1.0, %v2378_v37 }
 0x1c1   :  { %v2365_v10 = vmul.f32 %v2515_v56, %v2364_v49 }
 0x1c2   :  { %v2340_v26 = vsel %vm4438_vm3, %v2511_v17, %v2336_v38  ;;  %v2351_v23 = vadd.f32 %v2513_v2, %v2350_v6  ;;  %v2380_v28 = vmul.f32 %v2517_v31, %v2379_v53 }
 0x1c3   :  { %v2345_v12 = vsel %vm4433_vm9, %v2344_v47, %v2340_v26  ;;  %v2366_v50 = vadd.f32 %v2515_v56, %v2365_v10 }
 0x1c4   :  { %v2355_v8 = vsel %vm4443_vm11, %v2513_v2, %v2351_v23  ;;  %v2392_v46 = vsub.f32 1.0, %v2345_v12  ;;  %v2381_v21 = vadd.f32 %v2517_v31, %v2380_v28 }
 0x1c5   :  { %v2360_v36 = vsel %vm2357_vm1, %v2359_v25, %v2355_v8  ;;  %v2370_v63 = vsel %vm2369_vm15, %v2515_v56, %v2366_v50 }
 0x1c6   :  { %v2375_v14 = vsel %vm2372_vm14, %v2374_v16, %v2370_v63  ;;  %v2393_v42 = vsub.f32 1.0, %v2360_v36  ;;  %2396 = vst [vmem:[#allocation7] sm:$0xff] %v2392_v46  ;;  %v2385_v22 = vsel %vm4455_vm10, %v2517_v31, %v2381_v21 }
 0x1c7   :  { %v2394_v39 = vsub.f32 1.0, %v2375_v14  ;;  %v2390_v35 = vsel %vm2387_vm5, %v2389_v3, %v2385_v22 }
 0x1c8   :  { %2397 = vst [vmem:[#allocation7 + $0x8] sm:$0xff] %v2393_v42  ;;  %v2395_v9 = vsub.f32 1.0, %v2390_v35 }
 0x1c9   :  { %2398 = vst [vmem:[#allocation7 + $0x10] sm:$0xff] %v2394_v39 }
 0x1ca   :  { %2399 = vst [vmem:[#allocation7 + $0x18] sm:$0xff] %v2395_v9 }
 0x1cb   :  { %2410 = dma.vmem_to_hbm [thread:$0]  %s2406_s1, 512, %s2408_s23, [#allocation4]  }
 0x1cc   :  { %2598 = dma.done.wait [#allocation4], 512  }
 0x1cd   :  { %2599 = vsyncadd [#allocation4], 4294966784 }
 0x1ce   :  { %2415 = vsyncpa [#allocation3], 1 }
 0x1cf   :  { %2416 = vsyncpa [#allocation6], 1 }
 0x1d0   :  { %2417 = vsyncpa [#allocation4], 1 }

</bundles_post_ra>
